<compile_context>
chip_gen: v5e
topology: v5e:2x2
jax: 0.10.0
libtpu: 0.0.40
codegen_flags: <defaults>
</compile_context>

<pallas_src>
import functools

import jax
import jax.numpy as jnp
from jax import lax
from jax.experimental import pallas as pl
from jax.experimental.pallas import tpu as pltpu


def _round_up(x, m):
    return (x + m - 1) // m * m


def _gru_recurrent_kernel(gi_ref, h0_ref, wh_ref, bhn_ref, out_ref, h_scratch,
                          *, time_block, hidden_padded):
    """One grid step = `time_block` timesteps of the GRU recurrence.

    gi_ref  : (TB, BB, 3Hp)  precomputed input projection (+ folded biases)
    h0_ref  : (BB, Hp)       initial hidden state for this batch block
    wh_ref  : (Hp, 3Hp)      hidden->gates weight (gate blocks at Hp offsets)
    bhn_ref : (1, Hp)        b_hn (kept separate: multiplied by r)
    out_ref : (TB, BB, Hp)   hidden outputs for this time block
    h_scratch: (BB, Hp) f32  recurrent state, resident across the time grid axis
    """
    t_blk = pl.program_id(1)
    Hp = hidden_padded

    @pl.when(t_blk == 0)
    def _():
        h_scratch[...] = h0_ref[...].astype(jnp.float32)

    wh = wh_ref[...]                              # f32 or bf16 operands
    bhn = bhn_ref[...].astype(jnp.float32)        # (1, Hp)

    def step(i, h):
        gi = gi_ref[i].astype(jnp.float32)        # (BB, 3Hp), lane-aligned
        gh = jnp.dot(h.astype(wh.dtype), wh,
                     preferred_element_type=jnp.float32)   # (BB, 3Hp)

        # Lane-aligned gate slices (Hp is a multiple of 128).
        i_r = gi[:, 0:Hp]
        i_z = gi[:, Hp:2 * Hp]
        i_n = gi[:, 2 * Hp:3 * Hp]
        h_r = gh[:, 0:Hp]
        h_z = gh[:, Hp:2 * Hp]
        h_n = gh[:, 2 * Hp:3 * Hp] + bhn

        # All elementwise gate math in f32 (v5e has no bf16 VPU/EUP path).
        r = jax.nn.sigmoid(i_r + h_r)
        z = jax.nn.sigmoid(i_z + h_z)
        n = jnp.tanh(i_n + r * h_n)
        h_new = (1.0 - z) * n + z * h

        out_ref[i] = h_new.astype(out_ref.dtype)
        return h_new

    h_scratch[...] = lax.fori_loop(0, time_block, step, h_scratch[...],
                                   unroll=True)


def gru_forward_pallas(embedded_tbe, h0_bh, w_ih, w_hh, b_ih, b_hh, *,
                       time_block=8, batch_block=None,
                       matmul_dtype=jnp.float32):
    """embedded_tbe: (T, B, E) time-major; h0_bh: (B, H).
    w_ih: (3H, E), w_hh: (3H, H), b_ih/b_hh: (3H,)  (PyTorch parameter shapes).
    Returns (output (T, B, H) f32, h_n (B, H) f32)."""
    T, B, E = embedded_tbe.shape
    H = w_hh.shape[1]

    Hp = _round_up(H, 128)             # lane-aligned gate / output blocks
    if batch_block is None:
        Bp = _round_up(B, 8)
        BB = Bp
    else:                              # e.g. split batch across v7x's 2 TCs
        BB = _round_up(batch_block, 8)
        Bp = _round_up(B, BB)
    TB = int(time_block)
    Tp = _round_up(T, TB)
    NT = Tp // TB
    NB = Bp // BB

    w_ih = w_ih.astype(jnp.float32)
    w_hh = w_hh.astype(jnp.float32)
    b_ih = b_ih.astype(jnp.float32)
    b_hh = b_hh.astype(jnp.float32)

    def split_gates(p):                # PyTorch gate order: r, z, n
        return p[0:H], p[H:2 * H], p[2 * H:3 * H]

    wir, wiz, win = split_gates(w_ih)          # each (H, E)
    whr, whz, whn = split_gates(w_hh)          # each (H, H)
    bir, biz, bin_ = split_gates(b_ih)
    bhr, bhz, bhn = split_gates(b_hh)

    # Input-projection weight with gate blocks at lane-aligned Hp offsets.
    wi_p = jnp.zeros((E, 3 * Hp), jnp.float32)
    wi_p = wi_p.at[:, 0:H].set(wir.T)
    wi_p = wi_p.at[:, Hp:Hp + H].set(wiz.T)
    wi_p = wi_p.at[:, 2 * Hp:2 * Hp + H].set(win.T)

    # Fold b_ih (all gates) + b_hh (r, z only) into the precomputed gi.
    bias_fold = jnp.zeros((3 * Hp,), jnp.float32)
    bias_fold = bias_fold.at[0:H].set(bir + bhr)
    bias_fold = bias_fold.at[Hp:Hp + H].set(biz + bhz)
    bias_fold = bias_fold.at[2 * Hp:2 * Hp + H].set(bin_)

    # Recurrent weight; padded rows/cols are zero so padded hidden lanes stay 0
    # and never leak into real lanes.
    wh_p = jnp.zeros((Hp, 3 * Hp), jnp.float32)
    wh_p = wh_p.at[0:H, 0:H].set(whr.T)
    wh_p = wh_p.at[0:H, Hp:Hp + H].set(whz.T)
    wh_p = wh_p.at[0:H, 2 * Hp:2 * Hp + H].set(whn.T)
    wh_p = wh_p.astype(matmul_dtype)

    bhn_p = jnp.zeros((1, Hp), jnp.float32).at[0, 0:H].set(bhn)

    # Pad activations (zeros are harmless: padded time/batch are sliced off,
    # padded hidden lanes stay exactly zero through the recurrence).
    x = jnp.zeros((Tp, Bp, E), jnp.float32).at[:T, :B].set(
        embedded_tbe.astype(jnp.float32))
    h0_p = jnp.zeros((Bp, Hp), jnp.float32).at[:B, :H].set(
        h0_bh.astype(jnp.float32))

    # ---- Hoisted input projection: one big matmul for all timesteps (XLA) ----
    x2d = x.reshape(Tp * Bp, E)
    if matmul_dtype == jnp.float32:
        gi2d = jnp.dot(x2d, wi_p, precision=jax.lax.Precision.HIGHEST)
    else:
        gi2d = jnp.dot(x2d.astype(matmul_dtype), wi_p.astype(matmul_dtype),
                       preferred_element_type=jnp.float32)
    gi = (gi2d.astype(jnp.float32) + bias_fold).reshape(Tp, Bp, 3 * Hp)

    # VMEM budget (double-buffered blocks + resident weights + scratch), with
    # headroom, capped well under v7x's 64 MiB physical VMEM.
    w_item = jnp.dtype(matmul_dtype).itemsize
    vmem_est = (2 * TB * BB * 3 * Hp * 4      # gi blocks
                + 2 * TB * BB * Hp * 4        # out blocks
                + 2 * BB * Hp * 4             # h0
                + 2 * Hp * 3 * Hp * w_item    # wh
                + 2 * Hp * 4                  # bhn
                + BB * Hp * 4)                # h scratch
    vmem_limit = int(min(max(2 * vmem_est, 4 << 20), 48 << 20))

    kernel = functools.partial(_gru_recurrent_kernel,
                               time_block=TB, hidden_padded=Hp)

    out_tbh = pl.pallas_call(
        kernel,
        out_shape=jax.ShapeDtypeStruct((Tp, Bp, Hp), jnp.float32),
        grid_spec=pltpu.PrefetchScalarGridSpec(
            num_scalar_prefetch=0,
            grid=(NB, NT),                                     # batch, time
            in_specs=[
                pl.BlockSpec((TB, BB, 3 * Hp), lambda b, t: (t, b, 0)),  # gi
                pl.BlockSpec((BB, Hp), lambda b, t: (b, 0)),             # h0
                pl.BlockSpec((Hp, 3 * Hp), lambda b, t: (0, 0)),         # wh
                pl.BlockSpec((1, Hp), lambda b, t: (0, 0)),              # b_hn
            ],
            out_specs=pl.BlockSpec((TB, BB, Hp), lambda b, t: (t, b, 0)),
            scratch_shapes=[pltpu.VMEM((BB, Hp), jnp.float32)],
        ),
        compiler_params=pltpu.CompilerParams(
            dimension_semantics=("parallel", "arbitrary"),  # batch ∥, time seq
            vmem_limit_bytes=vmem_limit),
    )(gi, h0_p, wh_p, bhn_p)

    output = out_tbh[:T, :B, :H]          # (T, B, H)
    h_n = out_tbh[T - 1, :B, :H]          # final hidden == last real timestep
    return output, h_n


class GRUEncoderPallas:
    """JAX/Pallas port of the PyTorch GRUEncoder (single-layer, batch_first)."""

    def __init__(self, vocab_size, emd_dim, hidden_size, key,
                 time_block=8, batch_block=None, matmul_dtype=jnp.float32):
        self.vocab_size = vocab_size
        self.emd_dim = emd_dim
        self.hidden_size = hidden_size
        self.time_block = time_block
        self.batch_block = batch_block
        self.matmul_dtype = matmul_dtype
        k_emb, k_wi, k_wh, k_bi, k_bh = jax.random.split(key, 5)
        # nn.Embedding init ~ N(0, 1)
        self.embedding = jax.random.normal(
            k_emb, (vocab_size, emd_dim), dtype=jnp.float32)
        # nn.GRU init ~ U(-1/sqrt(H), 1/sqrt(H))
        s = 1.0 / jnp.sqrt(jnp.float32(hidden_size))
        self.w_ih = jax.random.uniform(
            k_wi, (3 * hidden_size, emd_dim), jnp.float32, -s, s)
        self.w_hh = jax.random.uniform(
            k_wh, (3 * hidden_size, hidden_size), jnp.float32, -s, s)
        self.b_ih = jax.random.uniform(
            k_bi, (3 * hidden_size,), jnp.float32, -s, s)
        self.b_hh = jax.random.uniform(
            k_bh, (3 * hidden_size,), jnp.float32, -s, s)

    def __call__(self, input_ids, hidden):
        """input_ids: (B, T) int32; hidden: (1, B, H) f32.
        Returns (output (B, T, H), hidden (1, B, H)) like nn.GRU(batch_first)."""
        # Embedding gather directly in time-major order: only the tiny int32 id
        # matrix is transposed, not the (B, T, E) activation tensor.
        ids_tb = jnp.transpose(input_ids, (1, 0))               # (T, B)
        embedded_tbe = jnp.take(self.embedding, ids_tb, axis=0)  # (T, B, E)
        h0 = hidden[0]                                          # (B, H)
        out_tbh, h_n = gru_forward_pallas(
            embedded_tbe, h0, self.w_ih, self.w_hh, self.b_ih, self.b_hh,
            time_block=self.time_block, batch_block=self.batch_block,
            matmul_dtype=self.matmul_dtype)
        output = jnp.transpose(out_tbh, (1, 0, 2))              # (B, T, H)
        return output, h_n[None, :, :]                          # (1, B, H)


def _gru_reference(embedded_bte, h0_bh, w_ih, w_hh, b_ih, b_hh):
    """Pure-JAX reference (same math as torch.nn.GRU forward), f32."""
    H = w_hh.shape[1]
    hi = jax.lax.Precision.HIGHEST

    def step(h, x):
        gi = jnp.dot(x, w_ih.T, precision=hi) + b_ih
        gh = jnp.dot(h, w_hh.T, precision=hi) + b_hh
        i_r, i_z, i_n = gi[:, :H], gi[:, H:2 * H], gi[:, 2 * H:]
        h_r, h_z, h_n = gh[:, :H], gh[:, H:2 * H], gh[:, 2 * H:]
        r = jax.nn.sigmoid(i_r + h_r)
        z = jax.nn.sigmoid(i_z + h_z)
        n = jnp.tanh(i_n + r * h_n)
        h_new = (1.0 - z) * n + z * h
        return h_new, h_new

    xs = jnp.transpose(embedded_bte, (1, 0, 2))   # (T, B, E)
    h_n, ys = jax.lax.scan(step, h0_bh, xs)
    return jnp.transpose(ys, (1, 0, 2)), h_n


if __name__ == "__main__":
    vocab_size, emd_dim, hidden_size = 50, 16, 32
    batch, seq = 2, 8

    key = jax.random.PRNGKey(0)
    k_model, k_ids = jax.random.split(key)

    model = GRUEncoderPallas(vocab_size, emd_dim, hidden_size, k_model,
                             time_block=8)

    input_ids = jax.random.randint(k_ids, (batch, seq), 0, vocab_size,
                                   dtype=jnp.int32)
    h0 = jnp.zeros((1, batch, hidden_size), dtype=jnp.float32)

    output, hidden = model(input_ids, h0)
    output = jax.block_until_ready(output)
    hidden = jax.block_until_ready(hidden)

    # Correctness check against pure-JAX reference of the torch GRU math.
    embedded = jnp.take(model.embedding, input_ids, axis=0)
    ref_out, ref_hn = _gru_reference(embedded, h0[0], model.w_ih, model.w_hh,
                                     model.b_ih, model.b_hh)
    assert output.shape == (batch, seq, hidden_size)
    assert hidden.shape == (1, batch, hidden_size)
    assert jnp.allclose(output, ref_out, atol=1e-4, rtol=1e-4)
    assert jnp.allclose(hidden[0], ref_hn, atol=1e-4, rtol=1e-4)

    # bf16 MXU-operand variant (recommended on v5e/v6e): f32 state + f32 gate
    # elementwise math, bf16 matmul operands -> looser tolerance.
    model_bf16 = GRUEncoderPallas(vocab_size, emd_dim, hidden_size, k_model,
                                  time_block=8, matmul_dtype=jnp.bfloat16)
    out_bf16, hid_bf16 = model_bf16(input_ids, h0)
    out_bf16 = jax.block_until_ready(out_bf16)
    hid_bf16 = jax.block_until_ready(hid_bf16)
    assert jnp.allclose(out_bf16, ref_out, atol=5e-2, rtol=5e-2)
    assert jnp.allclose(hid_bf16[0], ref_hn, atol=5e-2, rtol=5e-2)

    print("KERNEL_OK")
</pallas_src>

<mosaic_0001>
module attributes {stable_mosaic.version = 11 : i64} {
  func.func @_gru_recurrent_kernel(%arg0: i32, %arg1: i32, %arg2: memref<8x8x384xf32, #tpu.memory_space<vmem>>, %arg3: memref<8x128xf32, #tpu.memory_space<vmem>>, %arg4: memref<128x384xf32, #tpu.memory_space<vmem>>, %arg5: memref<1x128xf32, #tpu.memory_space<vmem>>, %arg6: memref<8x8x128xf32, #tpu.memory_space<vmem>>, %arg7: memref<8x128xf32, #tpu.memory_space<vmem>>) attributes {dimension_semantics = [#tpu.dimension_semantics<parallel>, #tpu.dimension_semantics<arbitrary>], iteration_bounds = array<i64: 1, 1>, scalar_prefetch = 0 : i64, scratch_operands = 1 : i64, tpu.core_type = #tpu.core_type<tc>, window_params = [{transform_indices = @transform_0, window_bounds = array<i64: 8, 8, 384>}, {transform_indices = @transform_1, window_bounds = array<i64: 8, 128>}, {pipeline_mode = #tpu.pipeline_mode<synchronous>, transform_indices = @transform_2, window_bounds = array<i64: 128, 384>}, {pipeline_mode = #tpu.pipeline_mode<synchronous>, transform_indices = @transform_3, window_bounds = array<i64: 1, 128>}, {transform_indices = @transform_4, window_bounds = array<i64: 8, 8, 128>}]} {
    %c0_i32 = arith.constant 0 : i32
    %0 = arith.cmpi eq, %arg1, %c0_i32 : i32
    %1 = arith.extui %0 : i1 to i32
    %c0_i32_0 = arith.constant 0 : i32
    %2 = arith.cmpi ne, %1, %c0_i32_0 : i32
    scf.if %2 {
      %c0_72 = arith.constant 0 : index
      %c0_73 = arith.constant 0 : index
      %295 = vector.load %arg3[%c0_72, %c0_73] : memref<8x128xf32, #tpu.memory_space<vmem>>, vector<8x128xf32>
      %c0_74 = arith.constant 0 : index
      %c0_75 = arith.constant 0 : index
      %296 = vector.load %arg7[%c0_74, %c0_75] : memref<8x128xf32, #tpu.memory_space<vmem>>, vector<8x128xf32>
      tpu.vector_store %arg7[%c0_74, %c0_75], %295 {strides = array<i32>} : memref<8x128xf32, #tpu.memory_space<vmem>>, vector<8x128xf32>,
    } else {
    }
    %c0 = arith.constant 0 : index
    %c0_1 = arith.constant 0 : index
    %3 = vector.load %arg4[%c0, %c0_1] : memref<128x384xf32, #tpu.memory_space<vmem>>, vector<128x384xf32>
    %c0_2 = arith.constant 0 : index
    %c0_3 = arith.constant 0 : index
    %4 = vector.load %arg5[%c0_2, %c0_3] : memref<1x128xf32, #tpu.memory_space<vmem>>, vector<1x128xf32>
    %c0_4 = arith.constant 0 : index
    %c0_5 = arith.constant 0 : index
    %5 = vector.load %arg7[%c0_4, %c0_5] : memref<8x128xf32, #tpu.memory_space<vmem>>, vector<8x128xf32>
    %c0_i32_6 = arith.constant 0 : i32
    %6 = arith.index_cast %c0_i32_6 : i32 to index
    %c0_7 = arith.constant 0 : index
    %c0_8 = arith.constant 0 : index
    %7 = vector.load %arg2[%6, %c0_7, %c0_8] : memref<8x8x384xf32, #tpu.memory_space<vmem>>, vector<1x8x384xf32>
    %8 = vector.shape_cast %7 : vector<1x8x384xf32> to vector<8x384xf32>
    %cst = arith.constant dense<0.000000e+00> : vector<8x384xf32>
    %9 = tpu.matmul %5, %3, %cst {dimension_numbers = #tpu.dot_dimension_numbers<[1], [0], [0], [1], [0, 0, 1, 1], [], []>} : vector<8x128xf32>, vector<128x384xf32>, vector<8x384xf32> -> vector<8x384xf32>
    %10 = vector.extract_strided_slice %8 {offsets = [0, 0], sizes = [8, 128], strides = [1, 1]} : vector<8x384xf32> to vector<8x128xf32>
    %11 = vector.extract_strided_slice %8 {offsets = [0, 128], sizes = [8, 128], strides = [1, 1]} : vector<8x384xf32> to vector<8x128xf32>
    %12 = vector.extract_strided_slice %8 {offsets = [0, 256], sizes = [8, 128], strides = [1, 1]} : vector<8x384xf32> to vector<8x128xf32>
    %13 = vector.extract_strided_slice %9 {offsets = [0, 0], sizes = [8, 128], strides = [1, 1]} : vector<8x384xf32> to vector<8x128xf32>
    %14 = vector.extract_strided_slice %9 {offsets = [0, 128], sizes = [8, 128], strides = [1, 1]} : vector<8x384xf32> to vector<8x128xf32>
    %15 = vector.extract_strided_slice %9 {offsets = [0, 256], sizes = [8, 128], strides = [1, 1]} : vector<8x384xf32> to vector<8x128xf32>
    %16 = vector.broadcast %4 : vector<1x128xf32> to vector<8x128xf32>
    %17 = arith.addf %15, %16 : vector<8x128xf32>
    %18 = arith.addf %10, %13 : vector<8x128xf32>
    %19 = arith.negf %18 : vector<8x128xf32>
    %20 = math.exp %19 : vector<8x128xf32>
    %cst_9 = arith.constant 1.000000e+00 : f32
    %21 = vector.broadcast %cst_9 : f32 to vector<8x128xf32>
    %22 = arith.addf %21, %20 : vector<8x128xf32>
    %23 = arith.divf %21, %22 : vector<8x128xf32>
    %24 = arith.addf %11, %14 : vector<8x128xf32>
    %25 = arith.negf %24 : vector<8x128xf32>
    %26 = math.exp %25 : vector<8x128xf32>
    %cst_10 = arith.constant 1.000000e+00 : f32
    %27 = vector.broadcast %cst_10 : f32 to vector<8x128xf32>
    %28 = arith.addf %27, %26 : vector<8x128xf32>
    %29 = arith.divf %27, %28 : vector<8x128xf32>
    %30 = arith.mulf %23, %17 : vector<8x128xf32>
    %31 = arith.addf %12, %30 : vector<8x128xf32>
    %32 = math.tanh %31 : vector<8x128xf32>
    %cst_11 = arith.constant 1.000000e+00 : f32
    %33 = vector.broadcast %cst_11 : f32 to vector<8x128xf32>
    %34 = arith.subf %33, %29 : vector<8x128xf32>
    %35 = arith.mulf %34, %32 : vector<8x128xf32>
    %36 = arith.mulf %29, %5 : vector<8x128xf32>
    %37 = arith.addf %35, %36 : vector<8x128xf32>
    %38 = arith.index_cast %c0_i32_6 : i32 to index
    %c0_12 = arith.constant 0 : index
    %c0_13 = arith.constant 0 : index
    %39 = vector.load %arg6[%38, %c0_12, %c0_13] : memref<8x8x128xf32, #tpu.memory_space<vmem>>, vector<1x8x128xf32>
    %40 = vector.shape_cast %39 : vector<1x8x128xf32> to vector<8x128xf32>
    %41 = vector.shape_cast %37 : vector<8x128xf32> to vector<1x8x128xf32>
    tpu.vector_store %arg6[%38, %c0_12, %c0_13], %41 {strides = array<i32>} : memref<8x8x128xf32, #tpu.memory_space<vmem>>, vector<1x8x128xf32>,
    %c1_i32 = arith.constant 1 : i32
    %42 = arith.index_cast %c1_i32 : i32 to index
    %c0_14 = arith.constant 0 : index
    %c0_15 = arith.constant 0 : index
    %43 = vector.load %arg2[%42, %c0_14, %c0_15] : memref<8x8x384xf32, #tpu.memory_space<vmem>>, vector<1x8x384xf32>
    %44 = vector.shape_cast %43 : vector<1x8x384xf32> to vector<8x384xf32>
    %cst_16 = arith.constant dense<0.000000e+00> : vector<8x384xf32>
    %45 = tpu.matmul %37, %3, %cst_16 {dimension_numbers = #tpu.dot_dimension_numbers<[1], [0], [0], [1], [0, 0, 1, 1], [], []>} : vector<8x128xf32>, vector<128x384xf32>, vector<8x384xf32> -> vector<8x384xf32>
    %46 = vector.extract_strided_slice %44 {offsets = [0, 0], sizes = [8, 128], strides = [1, 1]} : vector<8x384xf32> to vector<8x128xf32>
    %47 = vector.extract_strided_slice %44 {offsets = [0, 128], sizes = [8, 128], strides = [1, 1]} : vector<8x384xf32> to vector<8x128xf32>
    %48 = vector.extract_strided_slice %44 {offsets = [0, 256], sizes = [8, 128], strides = [1, 1]} : vector<8x384xf32> to vector<8x128xf32>
    %49 = vector.extract_strided_slice %45 {offsets = [0, 0], sizes = [8, 128], strides = [1, 1]} : vector<8x384xf32> to vector<8x128xf32>
    %50 = vector.extract_strided_slice %45 {offsets = [0, 128], sizes = [8, 128], strides = [1, 1]} : vector<8x384xf32> to vector<8x128xf32>
    %51 = vector.extract_strided_slice %45 {offsets = [0, 256], sizes = [8, 128], strides = [1, 1]} : vector<8x384xf32> to vector<8x128xf32>
    %52 = vector.broadcast %4 : vector<1x128xf32> to vector<8x128xf32>
    %53 = arith.addf %51, %52 : vector<8x128xf32>
    %54 = arith.addf %46, %49 : vector<8x128xf32>
    %55 = arith.negf %54 : vector<8x128xf32>
    %56 = math.exp %55 : vector<8x128xf32>
    %cst_17 = arith.constant 1.000000e+00 : f32
    %57 = vector.broadcast %cst_17 : f32 to vector<8x128xf32>
    %58 = arith.addf %57, %56 : vector<8x128xf32>
    %59 = arith.divf %57, %58 : vector<8x128xf32>
    %60 = arith.addf %47, %50 : vector<8x128xf32>
    %61 = arith.negf %60 : vector<8x128xf32>
    %62 = math.exp %61 : vector<8x128xf32>
    %cst_18 = arith.constant 1.000000e+00 : f32
    %63 = vector.broadcast %cst_18 : f32 to vector<8x128xf32>
    %64 = arith.addf %63, %62 : vector<8x128xf32>
    %65 = arith.divf %63, %64 : vector<8x128xf32>
    %66 = arith.mulf %59, %53 : vector<8x128xf32>
    %67 = arith.addf %48, %66 : vector<8x128xf32>
    %68 = math.tanh %67 : vector<8x128xf32>
    %cst_19 = arith.constant 1.000000e+00 : f32
    %69 = vector.broadcast %cst_19 : f32 to vector<8x128xf32>
    %70 = arith.subf %69, %65 : vector<8x128xf32>
    %71 = arith.mulf %70, %68 : vector<8x128xf32>
    %72 = arith.mulf %65, %37 : vector<8x128xf32>
    %73 = arith.addf %71, %72 : vector<8x128xf32>
    %74 = arith.index_cast %c1_i32 : i32 to index
    %c0_20 = arith.constant 0 : index
    %c0_21 = arith.constant 0 : index
    %75 = vector.load %arg6[%74, %c0_20, %c0_21] : memref<8x8x128xf32, #tpu.memory_space<vmem>>, vector<1x8x128xf32>
    %76 = vector.shape_cast %75 : vector<1x8x128xf32> to vector<8x128xf32>
    %77 = vector.shape_cast %73 : vector<8x128xf32> to vector<1x8x128xf32>
    tpu.vector_store %arg6[%74, %c0_20, %c0_21], %77 {strides = array<i32>} : memref<8x8x128xf32, #tpu.memory_space<vmem>>, vector<1x8x128xf32>,
    %c2_i32 = arith.constant 2 : i32
    %78 = arith.index_cast %c2_i32 : i32 to index
    %c0_22 = arith.constant 0 : index
    %c0_23 = arith.constant 0 : index
    %79 = vector.load %arg2[%78, %c0_22, %c0_23] : memref<8x8x384xf32, #tpu.memory_space<vmem>>, vector<1x8x384xf32>
    %80 = vector.shape_cast %79 : vector<1x8x384xf32> to vector<8x384xf32>
    %cst_24 = arith.constant dense<0.000000e+00> : vector<8x384xf32>
    %81 = tpu.matmul %73, %3, %cst_24 {dimension_numbers = #tpu.dot_dimension_numbers<[1], [0], [0], [1], [0, 0, 1, 1], [], []>} : vector<8x128xf32>, vector<128x384xf32>, vector<8x384xf32> -> vector<8x384xf32>
    %82 = vector.extract_strided_slice %80 {offsets = [0, 0], sizes = [8, 128], strides = [1, 1]} : vector<8x384xf32> to vector<8x128xf32>
    %83 = vector.extract_strided_slice %80 {offsets = [0, 128], sizes = [8, 128], strides = [1, 1]} : vector<8x384xf32> to vector<8x128xf32>
    %84 = vector.extract_strided_slice %80 {offsets = [0, 256], sizes = [8, 128], strides = [1, 1]} : vector<8x384xf32> to vector<8x128xf32>
    %85 = vector.extract_strided_slice %81 {offsets = [0, 0], sizes = [8, 128], strides = [1, 1]} : vector<8x384xf32> to vector<8x128xf32>
    %86 = vector.extract_strided_slice %81 {offsets = [0, 128], sizes = [8, 128], strides = [1, 1]} : vector<8x384xf32> to vector<8x128xf32>
    %87 = vector.extract_strided_slice %81 {offsets = [0, 256], sizes = [8, 128], strides = [1, 1]} : vector<8x384xf32> to vector<8x128xf32>
    %88 = vector.broadcast %4 : vector<1x128xf32> to vector<8x128xf32>
    %89 = arith.addf %87, %88 : vector<8x128xf32>
    %90 = arith.addf %82, %85 : vector<8x128xf32>
    %91 = arith.negf %90 : vector<8x128xf32>
    %92 = math.exp %91 : vector<8x128xf32>
    %cst_25 = arith.constant 1.000000e+00 : f32
    %93 = vector.broadcast %cst_25 : f32 to vector<8x128xf32>
    %94 = arith.addf %93, %92 : vector<8x128xf32>
    %95 = arith.divf %93, %94 : vector<8x128xf32>
    %96 = arith.addf %83, %86 : vector<8x128xf32>
    %97 = arith.negf %96 : vector<8x128xf32>
    %98 = math.exp %97 : vector<8x128xf32>
    %cst_26 = arith.constant 1.000000e+00 : f32
    %99 = vector.broadcast %cst_26 : f32 to vector<8x128xf32>
    %100 = arith.addf %99, %98 : vector<8x128xf32>
    %101 = arith.divf %99, %100 : vector<8x128xf32>
    %102 = arith.mulf %95, %89 : vector<8x128xf32>
    %103 = arith.addf %84, %102 : vector<8x128xf32>
    %104 = math.tanh %103 : vector<8x128xf32>
    %cst_27 = arith.constant 1.000000e+00 : f32
    %105 = vector.broadcast %cst_27 : f32 to vector<8x128xf32>
    %106 = arith.subf %105, %101 : vector<8x128xf32>
    %107 = arith.mulf %106, %104 : vector<8x128xf32>
    %108 = arith.mulf %101, %73 : vector<8x128xf32>
    %109 = arith.addf %107, %108 : vector<8x128xf32>
    %110 = arith.index_cast %c2_i32 : i32 to index
    %c0_28 = arith.constant 0 : index
    %c0_29 = arith.constant 0 : index
    %111 = vector.load %arg6[%110, %c0_28, %c0_29] : memref<8x8x128xf32, #tpu.memory_space<vmem>>, vector<1x8x128xf32>
    %112 = vector.shape_cast %111 : vector<1x8x128xf32> to vector<8x128xf32>
    %113 = vector.shape_cast %109 : vector<8x128xf32> to vector<1x8x128xf32>
    tpu.vector_store %arg6[%110, %c0_28, %c0_29], %113 {strides = array<i32>} : memref<8x8x128xf32, #tpu.memory_space<vmem>>, vector<1x8x128xf32>,
    %c3_i32 = arith.constant 3 : i32
    %114 = arith.index_cast %c3_i32 : i32 to index
    %c0_30 = arith.constant 0 : index
    %c0_31 = arith.constant 0 : index
    %115 = vector.load %arg2[%114, %c0_30, %c0_31] : memref<8x8x384xf32, #tpu.memory_space<vmem>>, vector<1x8x384xf32>
    %116 = vector.shape_cast %115 : vector<1x8x384xf32> to vector<8x384xf32>
    %cst_32 = arith.constant dense<0.000000e+00> : vector<8x384xf32>
    %117 = tpu.matmul %109, %3, %cst_32 {dimension_numbers = #tpu.dot_dimension_numbers<[1], [0], [0], [1], [0, 0, 1, 1], [], []>} : vector<8x128xf32>, vector<128x384xf32>, vector<8x384xf32> -> vector<8x384xf32>
    %118 = vector.extract_strided_slice %116 {offsets = [0, 0], sizes = [8, 128], strides = [1, 1]} : vector<8x384xf32> to vector<8x128xf32>
    %119 = vector.extract_strided_slice %116 {offsets = [0, 128], sizes = [8, 128], strides = [1, 1]} : vector<8x384xf32> to vector<8x128xf32>
    %120 = vector.extract_strided_slice %116 {offsets = [0, 256], sizes = [8, 128], strides = [1, 1]} : vector<8x384xf32> to vector<8x128xf32>
    %121 = vector.extract_strided_slice %117 {offsets = [0, 0], sizes = [8, 128], strides = [1, 1]} : vector<8x384xf32> to vector<8x128xf32>
    %122 = vector.extract_strided_slice %117 {offsets = [0, 128], sizes = [8, 128], strides = [1, 1]} : vector<8x384xf32> to vector<8x128xf32>
    %123 = vector.extract_strided_slice %117 {offsets = [0, 256], sizes = [8, 128], strides = [1, 1]} : vector<8x384xf32> to vector<8x128xf32>
    %124 = vector.broadcast %4 : vector<1x128xf32> to vector<8x128xf32>
    %125 = arith.addf %123, %124 : vector<8x128xf32>
    %126 = arith.addf %118, %121 : vector<8x128xf32>
    %127 = arith.negf %126 : vector<8x128xf32>
    %128 = math.exp %127 : vector<8x128xf32>
    %cst_33 = arith.constant 1.000000e+00 : f32
    %129 = vector.broadcast %cst_33 : f32 to vector<8x128xf32>
    %130 = arith.addf %129, %128 : vector<8x128xf32>
    %131 = arith.divf %129, %130 : vector<8x128xf32>
    %132 = arith.addf %119, %122 : vector<8x128xf32>
    %133 = arith.negf %132 : vector<8x128xf32>
    %134 = math.exp %133 : vector<8x128xf32>
    %cst_34 = arith.constant 1.000000e+00 : f32
    %135 = vector.broadcast %cst_34 : f32 to vector<8x128xf32>
    %136 = arith.addf %135, %134 : vector<8x128xf32>
    %137 = arith.divf %135, %136 : vector<8x128xf32>
    %138 = arith.mulf %131, %125 : vector<8x128xf32>
    %139 = arith.addf %120, %138 : vector<8x128xf32>
    %140 = math.tanh %139 : vector<8x128xf32>
    %cst_35 = arith.constant 1.000000e+00 : f32
    %141 = vector.broadcast %cst_35 : f32 to vector<8x128xf32>
    %142 = arith.subf %141, %137 : vector<8x128xf32>
    %143 = arith.mulf %142, %140 : vector<8x128xf32>
    %144 = arith.mulf %137, %109 : vector<8x128xf32>
    %145 = arith.addf %143, %144 : vector<8x128xf32>
    %146 = arith.index_cast %c3_i32 : i32 to index
    %c0_36 = arith.constant 0 : index
    %c0_37 = arith.constant 0 : index
    %147 = vector.load %arg6[%146, %c0_36, %c0_37] : memref<8x8x128xf32, #tpu.memory_space<vmem>>, vector<1x8x128xf32>
    %148 = vector.shape_cast %147 : vector<1x8x128xf32> to vector<8x128xf32>
    %149 = vector.shape_cast %145 : vector<8x128xf32> to vector<1x8x128xf32>
    tpu.vector_store %arg6[%146, %c0_36, %c0_37], %149 {strides = array<i32>} : memref<8x8x128xf32, #tpu.memory_space<vmem>>, vector<1x8x128xf32>,
    %c4_i32 = arith.constant 4 : i32
    %150 = arith.index_cast %c4_i32 : i32 to index
    %c0_38 = arith.constant 0 : index
    %c0_39 = arith.constant 0 : index
    %151 = vector.load %arg2[%150, %c0_38, %c0_39] : memref<8x8x384xf32, #tpu.memory_space<vmem>>, vector<1x8x384xf32>
    %152 = vector.shape_cast %151 : vector<1x8x384xf32> to vector<8x384xf32>
    %cst_40 = arith.constant dense<0.000000e+00> : vector<8x384xf32>
    %153 = tpu.matmul %145, %3, %cst_40 {dimension_numbers = #tpu.dot_dimension_numbers<[1], [0], [0], [1], [0, 0, 1, 1], [], []>} : vector<8x128xf32>, vector<128x384xf32>, vector<8x384xf32> -> vector<8x384xf32>
    %154 = vector.extract_strided_slice %152 {offsets = [0, 0], sizes = [8, 128], strides = [1, 1]} : vector<8x384xf32> to vector<8x128xf32>
    %155 = vector.extract_strided_slice %152 {offsets = [0, 128], sizes = [8, 128], strides = [1, 1]} : vector<8x384xf32> to vector<8x128xf32>
    %156 = vector.extract_strided_slice %152 {offsets = [0, 256], sizes = [8, 128], strides = [1, 1]} : vector<8x384xf32> to vector<8x128xf32>
    %157 = vector.extract_strided_slice %153 {offsets = [0, 0], sizes = [8, 128], strides = [1, 1]} : vector<8x384xf32> to vector<8x128xf32>
    %158 = vector.extract_strided_slice %153 {offsets = [0, 128], sizes = [8, 128], strides = [1, 1]} : vector<8x384xf32> to vector<8x128xf32>
    %159 = vector.extract_strided_slice %153 {offsets = [0, 256], sizes = [8, 128], strides = [1, 1]} : vector<8x384xf32> to vector<8x128xf32>
    %160 = vector.broadcast %4 : vector<1x128xf32> to vector<8x128xf32>
    %161 = arith.addf %159, %160 : vector<8x128xf32>
    %162 = arith.addf %154, %157 : vector<8x128xf32>
    %163 = arith.negf %162 : vector<8x128xf32>
    %164 = math.exp %163 : vector<8x128xf32>
    %cst_41 = arith.constant 1.000000e+00 : f32
    %165 = vector.broadcast %cst_41 : f32 to vector<8x128xf32>
    %166 = arith.addf %165, %164 : vector<8x128xf32>
    %167 = arith.divf %165, %166 : vector<8x128xf32>
    %168 = arith.addf %155, %158 : vector<8x128xf32>
    %169 = arith.negf %168 : vector<8x128xf32>
    %170 = math.exp %169 : vector<8x128xf32>
    %cst_42 = arith.constant 1.000000e+00 : f32
    %171 = vector.broadcast %cst_42 : f32 to vector<8x128xf32>
    %172 = arith.addf %171, %170 : vector<8x128xf32>
    %173 = arith.divf %171, %172 : vector<8x128xf32>
    %174 = arith.mulf %167, %161 : vector<8x128xf32>
    %175 = arith.addf %156, %174 : vector<8x128xf32>
    %176 = math.tanh %175 : vector<8x128xf32>
    %cst_43 = arith.constant 1.000000e+00 : f32
    %177 = vector.broadcast %cst_43 : f32 to vector<8x128xf32>
    %178 = arith.subf %177, %173 : vector<8x128xf32>
    %179 = arith.mulf %178, %176 : vector<8x128xf32>
    %180 = arith.mulf %173, %145 : vector<8x128xf32>
    %181 = arith.addf %179, %180 : vector<8x128xf32>
    %182 = arith.index_cast %c4_i32 : i32 to index
    %c0_44 = arith.constant 0 : index
    %c0_45 = arith.constant 0 : index
    %183 = vector.load %arg6[%182, %c0_44, %c0_45] : memref<8x8x128xf32, #tpu.memory_space<vmem>>, vector<1x8x128xf32>
    %184 = vector.shape_cast %183 : vector<1x8x128xf32> to vector<8x128xf32>
    %185 = vector.shape_cast %181 : vector<8x128xf32> to vector<1x8x128xf32>
    tpu.vector_store %arg6[%182, %c0_44, %c0_45], %185 {strides = array<i32>} : memref<8x8x128xf32, #tpu.memory_space<vmem>>, vector<1x8x128xf32>,
    %c5_i32 = arith.constant 5 : i32
    %186 = arith.index_cast %c5_i32 : i32 to index
    %c0_46 = arith.constant 0 : index
    %c0_47 = arith.constant 0 : index
    %187 = vector.load %arg2[%186, %c0_46, %c0_47] : memref<8x8x384xf32, #tpu.memory_space<vmem>>, vector<1x8x384xf32>
    %188 = vector.shape_cast %187 : vector<1x8x384xf32> to vector<8x384xf32>
    %cst_48 = arith.constant dense<0.000000e+00> : vector<8x384xf32>
    %189 = tpu.matmul %181, %3, %cst_48 {dimension_numbers = #tpu.dot_dimension_numbers<[1], [0], [0], [1], [0, 0, 1, 1], [], []>} : vector<8x128xf32>, vector<128x384xf32>, vector<8x384xf32> -> vector<8x384xf32>
    %190 = vector.extract_strided_slice %188 {offsets = [0, 0], sizes = [8, 128], strides = [1, 1]} : vector<8x384xf32> to vector<8x128xf32>
    %191 = vector.extract_strided_slice %188 {offsets = [0, 128], sizes = [8, 128], strides = [1, 1]} : vector<8x384xf32> to vector<8x128xf32>
    %192 = vector.extract_strided_slice %188 {offsets = [0, 256], sizes = [8, 128], strides = [1, 1]} : vector<8x384xf32> to vector<8x128xf32>
    %193 = vector.extract_strided_slice %189 {offsets = [0, 0], sizes = [8, 128], strides = [1, 1]} : vector<8x384xf32> to vector<8x128xf32>
    %194 = vector.extract_strided_slice %189 {offsets = [0, 128], sizes = [8, 128], strides = [1, 1]} : vector<8x384xf32> to vector<8x128xf32>
    %195 = vector.extract_strided_slice %189 {offsets = [0, 256], sizes = [8, 128], strides = [1, 1]} : vector<8x384xf32> to vector<8x128xf32>
    %196 = vector.broadcast %4 : vector<1x128xf32> to vector<8x128xf32>
    %197 = arith.addf %195, %196 : vector<8x128xf32>
    %198 = arith.addf %190, %193 : vector<8x128xf32>
    %199 = arith.negf %198 : vector<8x128xf32>
    %200 = math.exp %199 : vector<8x128xf32>
    %cst_49 = arith.constant 1.000000e+00 : f32
    %201 = vector.broadcast %cst_49 : f32 to vector<8x128xf32>
    %202 = arith.addf %201, %200 : vector<8x128xf32>
    %203 = arith.divf %201, %202 : vector<8x128xf32>
    %204 = arith.addf %191, %194 : vector<8x128xf32>
    %205 = arith.negf %204 : vector<8x128xf32>
    %206 = math.exp %205 : vector<8x128xf32>
    %cst_50 = arith.constant 1.000000e+00 : f32
    %207 = vector.broadcast %cst_50 : f32 to vector<8x128xf32>
    %208 = arith.addf %207, %206 : vector<8x128xf32>
    %209 = arith.divf %207, %208 : vector<8x128xf32>
    %210 = arith.mulf %203, %197 : vector<8x128xf32>
    %211 = arith.addf %192, %210 : vector<8x128xf32>
    %212 = math.tanh %211 : vector<8x128xf32>
    %cst_51 = arith.constant 1.000000e+00 : f32
    %213 = vector.broadcast %cst_51 : f32 to vector<8x128xf32>
    %214 = arith.subf %213, %209 : vector<8x128xf32>
    %215 = arith.mulf %214, %212 : vector<8x128xf32>
    %216 = arith.mulf %209, %181 : vector<8x128xf32>
    %217 = arith.addf %215, %216 : vector<8x128xf32>
    %218 = arith.index_cast %c5_i32 : i32 to index
    %c0_52 = arith.constant 0 : index
    %c0_53 = arith.constant 0 : index
    %219 = vector.load %arg6[%218, %c0_52, %c0_53] : memref<8x8x128xf32, #tpu.memory_space<vmem>>, vector<1x8x128xf32>
    %220 = vector.shape_cast %219 : vector<1x8x128xf32> to vector<8x128xf32>
    %221 = vector.shape_cast %217 : vector<8x128xf32> to vector<1x8x128xf32>
    tpu.vector_store %arg6[%218, %c0_52, %c0_53], %221 {strides = array<i32>} : memref<8x8x128xf32, #tpu.memory_space<vmem>>, vector<1x8x128xf32>,
    %c6_i32 = arith.constant 6 : i32
    %222 = arith.index_cast %c6_i32 : i32 to index
    %c0_54 = arith.constant 0 : index
    %c0_55 = arith.constant 0 : index
    %223 = vector.load %arg2[%222, %c0_54, %c0_55] : memref<8x8x384xf32, #tpu.memory_space<vmem>>, vector<1x8x384xf32>
    %224 = vector.shape_cast %223 : vector<1x8x384xf32> to vector<8x384xf32>
    %cst_56 = arith.constant dense<0.000000e+00> : vector<8x384xf32>
    %225 = tpu.matmul %217, %3, %cst_56 {dimension_numbers = #tpu.dot_dimension_numbers<[1], [0], [0], [1], [0, 0, 1, 1], [], []>} : vector<8x128xf32>, vector<128x384xf32>, vector<8x384xf32> -> vector<8x384xf32>
    %226 = vector.extract_strided_slice %224 {offsets = [0, 0], sizes = [8, 128], strides = [1, 1]} : vector<8x384xf32> to vector<8x128xf32>
    %227 = vector.extract_strided_slice %224 {offsets = [0, 128], sizes = [8, 128], strides = [1, 1]} : vector<8x384xf32> to vector<8x128xf32>
    %228 = vector.extract_strided_slice %224 {offsets = [0, 256], sizes = [8, 128], strides = [1, 1]} : vector<8x384xf32> to vector<8x128xf32>
    %229 = vector.extract_strided_slice %225 {offsets = [0, 0], sizes = [8, 128], strides = [1, 1]} : vector<8x384xf32> to vector<8x128xf32>
    %230 = vector.extract_strided_slice %225 {offsets = [0, 128], sizes = [8, 128], strides = [1, 1]} : vector<8x384xf32> to vector<8x128xf32>
    %231 = vector.extract_strided_slice %225 {offsets = [0, 256], sizes = [8, 128], strides = [1, 1]} : vector<8x384xf32> to vector<8x128xf32>
    %232 = vector.broadcast %4 : vector<1x128xf32> to vector<8x128xf32>
    %233 = arith.addf %231, %232 : vector<8x128xf32>
    %234 = arith.addf %226, %229 : vector<8x128xf32>
    %235 = arith.negf %234 : vector<8x128xf32>
    %236 = math.exp %235 : vector<8x128xf32>
    %cst_57 = arith.constant 1.000000e+00 : f32
    %237 = vector.broadcast %cst_57 : f32 to vector<8x128xf32>
    %238 = arith.addf %237, %236 : vector<8x128xf32>
    %239 = arith.divf %237, %238 : vector<8x128xf32>
    %240 = arith.addf %227, %230 : vector<8x128xf32>
    %241 = arith.negf %240 : vector<8x128xf32>
    %242 = math.exp %241 : vector<8x128xf32>
    %cst_58 = arith.constant 1.000000e+00 : f32
    %243 = vector.broadcast %cst_58 : f32 to vector<8x128xf32>
    %244 = arith.addf %243, %242 : vector<8x128xf32>
    %245 = arith.divf %243, %244 : vector<8x128xf32>
    %246 = arith.mulf %239, %233 : vector<8x128xf32>
    %247 = arith.addf %228, %246 : vector<8x128xf32>
    %248 = math.tanh %247 : vector<8x128xf32>
    %cst_59 = arith.constant 1.000000e+00 : f32
    %249 = vector.broadcast %cst_59 : f32 to vector<8x128xf32>
    %250 = arith.subf %249, %245 : vector<8x128xf32>
    %251 = arith.mulf %250, %248 : vector<8x128xf32>
    %252 = arith.mulf %245, %217 : vector<8x128xf32>
    %253 = arith.addf %251, %252 : vector<8x128xf32>
    %254 = arith.index_cast %c6_i32 : i32 to index
    %c0_60 = arith.constant 0 : index
    %c0_61 = arith.constant 0 : index
    %255 = vector.load %arg6[%254, %c0_60, %c0_61] : memref<8x8x128xf32, #tpu.memory_space<vmem>>, vector<1x8x128xf32>
    %256 = vector.shape_cast %255 : vector<1x8x128xf32> to vector<8x128xf32>
    %257 = vector.shape_cast %253 : vector<8x128xf32> to vector<1x8x128xf32>
    tpu.vector_store %arg6[%254, %c0_60, %c0_61], %257 {strides = array<i32>} : memref<8x8x128xf32, #tpu.memory_space<vmem>>, vector<1x8x128xf32>,
    %c7_i32 = arith.constant 7 : i32
    %258 = arith.index_cast %c7_i32 : i32 to index
    %c0_62 = arith.constant 0 : index
    %c0_63 = arith.constant 0 : index
    %259 = vector.load %arg2[%258, %c0_62, %c0_63] : memref<8x8x384xf32, #tpu.memory_space<vmem>>, vector<1x8x384xf32>
    %260 = vector.shape_cast %259 : vector<1x8x384xf32> to vector<8x384xf32>
    %cst_64 = arith.constant dense<0.000000e+00> : vector<8x384xf32>
    %261 = tpu.matmul %253, %3, %cst_64 {dimension_numbers = #tpu.dot_dimension_numbers<[1], [0], [0], [1], [0, 0, 1, 1], [], []>} : vector<8x128xf32>, vector<128x384xf32>, vector<8x384xf32> -> vector<8x384xf32>
    %262 = vector.extract_strided_slice %260 {offsets = [0, 0], sizes = [8, 128], strides = [1, 1]} : vector<8x384xf32> to vector<8x128xf32>
    %263 = vector.extract_strided_slice %260 {offsets = [0, 128], sizes = [8, 128], strides = [1, 1]} : vector<8x384xf32> to vector<8x128xf32>
    %264 = vector.extract_strided_slice %260 {offsets = [0, 256], sizes = [8, 128], strides = [1, 1]} : vector<8x384xf32> to vector<8x128xf32>
    %265 = vector.extract_strided_slice %261 {offsets = [0, 0], sizes = [8, 128], strides = [1, 1]} : vector<8x384xf32> to vector<8x128xf32>
    %266 = vector.extract_strided_slice %261 {offsets = [0, 128], sizes = [8, 128], strides = [1, 1]} : vector<8x384xf32> to vector<8x128xf32>
    %267 = vector.extract_strided_slice %261 {offsets = [0, 256], sizes = [8, 128], strides = [1, 1]} : vector<8x384xf32> to vector<8x128xf32>
    %268 = vector.broadcast %4 : vector<1x128xf32> to vector<8x128xf32>
    %269 = arith.addf %267, %268 : vector<8x128xf32>
    %270 = arith.addf %262, %265 : vector<8x128xf32>
    %271 = arith.negf %270 : vector<8x128xf32>
    %272 = math.exp %271 : vector<8x128xf32>
    %cst_65 = arith.constant 1.000000e+00 : f32
    %273 = vector.broadcast %cst_65 : f32 to vector<8x128xf32>
    %274 = arith.addf %273, %272 : vector<8x128xf32>
    %275 = arith.divf %273, %274 : vector<8x128xf32>
    %276 = arith.addf %263, %266 : vector<8x128xf32>
    %277 = arith.negf %276 : vector<8x128xf32>
    %278 = math.exp %277 : vector<8x128xf32>
    %cst_66 = arith.constant 1.000000e+00 : f32
    %279 = vector.broadcast %cst_66 : f32 to vector<8x128xf32>
    %280 = arith.addf %279, %278 : vector<8x128xf32>
    %281 = arith.divf %279, %280 : vector<8x128xf32>
    %282 = arith.mulf %275, %269 : vector<8x128xf32>
    %283 = arith.addf %264, %282 : vector<8x128xf32>
    %284 = math.tanh %283 : vector<8x128xf32>
    %cst_67 = arith.constant 1.000000e+00 : f32
    %285 = vector.broadcast %cst_67 : f32 to vector<8x128xf32>
    %286 = arith.subf %285, %281 : vector<8x128xf32>
    %287 = arith.mulf %286, %284 : vector<8x128xf32>
    %288 = arith.mulf %281, %253 : vector<8x128xf32>
    %289 = arith.addf %287, %288 : vector<8x128xf32>
    %290 = arith.index_cast %c7_i32 : i32 to index
    %c0_68 = arith.constant 0 : index
    %c0_69 = arith.constant 0 : index
    %291 = vector.load %arg6[%290, %c0_68, %c0_69] : memref<8x8x128xf32, #tpu.memory_space<vmem>>, vector<1x8x128xf32>
    %292 = vector.shape_cast %291 : vector<1x8x128xf32> to vector<8x128xf32>
    %293 = vector.shape_cast %289 : vector<8x128xf32> to vector<1x8x128xf32>
    tpu.vector_store %arg6[%290, %c0_68, %c0_69], %293 {strides = array<i32>} : memref<8x8x128xf32, #tpu.memory_space<vmem>>, vector<1x8x128xf32>,
    %c8_i32 = arith.constant 8 : i32
    %c0_70 = arith.constant 0 : index
    %c0_71 = arith.constant 0 : index
    %294 = vector.load %arg7[%c0_70, %c0_71] : memref<8x128xf32, #tpu.memory_space<vmem>>, vector<8x128xf32>
    tpu.vector_store %arg7[%c0_70, %c0_71], %289 {strides = array<i32>} : memref<8x128xf32, #tpu.memory_space<vmem>>, vector<8x128xf32>,
    return
  }
  func.func @transform_0(%arg0: i32, %arg1: i32) -> (i32, i32, i32) {
    %c0_i32 = arith.constant 0 : i32
    %c0_i32_0 = arith.constant 0 : i32
    return %arg1, %arg0, %c0_i32 : i32, i32, i32
  }
  func.func @transform_1(%arg0: i32, %arg1: i32) -> (i32, i32) {
    %c0_i32 = arith.constant 0 : i32
    %c0_i32_0 = arith.constant 0 : i32
    return %arg0, %c0_i32 : i32, i32
  }
  func.func @transform_2(%arg0: i32, %arg1: i32) -> (i32, i32) {
    %c0_i32 = arith.constant 0 : i32
    %c0_i32_0 = arith.constant 0 : i32
    %c0_i32_1 = arith.constant 0 : i32
    return %c0_i32, %c0_i32_0 : i32, i32
  }
  func.func @transform_3(%arg0: i32, %arg1: i32) -> (i32, i32) {
    %c0_i32 = arith.constant 0 : i32
    %c0_i32_0 = arith.constant 0 : i32
    %c0_i32_1 = arith.constant 0 : i32
    return %c0_i32, %c0_i32_0 : i32, i32
  }
  func.func @transform_4(%arg0: i32, %arg1: i32) -> (i32, i32, i32) {
    %c0_i32 = arith.constant 0 : i32
    %c0_i32_0 = arith.constant 0 : i32
    return %arg1, %arg0, %c0_i32 : i32, i32, i32
  }
}

</mosaic_0001>

<bundles_post_ra>
// kernel: tpu_custom_call.1
= control target key start
LH: loop header
LB: loop body
LE: loop exit
PB: predicated region body
PF: predicated region fallthrough
CT: control target
= control target key end

     0   :  { %9 = vsyncpa [#allocation4], 0  ;;  %s1893_s0 = inlined_call_operand.hbm [shape: f32[8,8,384], index: 0, kind: input, shape index: {}]   ;;  %s1894_s1 = inlined_call_operand.hbm [shape: f32[8,128], index: 1, kind: input, shape index: {}]   ;;  %s1895_s2 = inlined_call_operand.hbm [shape: f32[128,384], index: 2, kind: input, shape index: {}]   ;;  %s1896_s3 = inlined_call_operand.vmem [shape: f32[1,128], index: 3, kind: input, shape index: {}]   ;;  %s1897_s4 = inlined_call_operand.hbm [shape: f32[8,8,128], index: 4, kind: output, shape index: {}]  }
   0x1   :  { %10 = vsyncpa [#allocation7], 0  ;;  %s30_s17 = sshll.u32 %s1894_s1, 4  ;;  %s31_s17 = int_to_ptr.hbm [resolvable:$true] %s30_s17 }
   0x2   :  { %11 = vsyncpa [#allocation5], 0  ;;  %s1309_s18 = smov [#allocation6]   ;;  %s16_s22 = sshll.u32 %s1893_s0, 4  ;;  %s17_s22 = int_to_ptr.hbm [resolvable:$true] %s16_s22 }
   0x3   :  { %s32_s19 = sshll.u32 %s1309_s18, 4  ;;  %s1310_s23 = smov [#allocation3]   ;;  %s33_s19 = int_to_ptr.vmem [resolvable:$true] %s32_s19 }
   0x4   :  { %35 = dma.hbm_to_vmem [thread:$0]  %s31_s17, 128, %s33_s19, [#allocation7]  }
   0x5   :  { %s18_s24 = sshll.u32 %s1310_s23, 4  ;;  %s1311_s25 = smov 384   ;;  %s19_s24 = int_to_ptr.vmem [resolvable:$true] %s18_s24 }
   0x6   :  { %s1312_s26 = smov 24   ;;  %s40_s1 = sshll.u32 %s1895_s2, 4  ;;  %s41_s1 = int_to_ptr.hbm [resolvable:$true] %s40_s1 }
   0x7   :  { %24 = dma.hbm_to_vmem [thread:$0]  %s17_s22, 3072, %s19_s24, [#allocation4], %s1311_s25, %s1311_s25, %s1312_s26  }
   0x8   :  { %s1313_s29 = smov [#allocation8]  }
   0x9   :  { %s42_s30 = sshll.u32 %s1313_s29, 4  ;;  %s43_s30 = int_to_ptr.vmem [resolvable:$true] %s42_s30 }
   0xa   :  { %48 = dma.hbm_to_vmem [thread:$0]  %s41_s1, 6144, %s43_s30, [#allocation7], %s1311_s25, %s1311_s25, %s1312_s26  }
   0xb   :  { %1303 = dma.done.wait [#allocation4], 3072  }
   0xc   :  { %1304 = vsyncadd [#allocation4], 4294964224 }
   0xd   :  { %1305 = dma.done.wait [#allocation7], 6272  }
   0xe   :  { %1306 = vsyncadd [#allocation7], 4294961024  ;;  %v1351_v0 = vld [vmem:[#allocation8 + $0x168] sm:$0xff]  ;;  %v1353_v1 = vld [vmem:[#allocation8 + $0x170] sm:$0xff]  ;;  %s1039_s10 = sshll.u32 %s1897_s4, 4  ;;  %s1315_s11 = smov 128   ;;  %s1040_s10 = int_to_ptr.hbm [resolvable:$true] %s1039_s10 }
   0xf   :  { %v1355_v2 = vld [vmem:[#allocation8 + $0x150] sm:$0xff]  ;;  %122 = vmatpush.msra.mxu0 %v1351_v0  ;;  %142 = vmatpush.msra.mxu1 %v1353_v1  ;;  %v1359_v3 = vld [vmem:[#allocation8 + $0x158] sm:$0xff]  ;;  %v1363_v5 = vld [vmem:[#allocation8 + $0x140] sm:$0xff]  ;;  %s1316_s12 = smov 8  }
  0x10   :  { %v1361_v4 = vld [vmem:[#allocation8 + $0x138] sm:$0xff]  ;;  %238 = vmatpush.msra.mxu3 %v1351_v0  ;;  %v1368_v6 = vld [vmem:[#allocation8 + $0x120] sm:$0xff]  ;;  %v1370_v7 = vld [vmem:[#allocation8 + $0x128] sm:$0xff] }
  0x11   :  { %123 = vmatpush.msra.mxu0 %v1355_v2  ;;  %143 = vmatpush.msra.mxu1 %v1359_v3  ;;  %v1375_v8 = vld [vmem:[#allocation8 + $0x108] sm:$0xff]  ;;  %v1377_v9 = vld [vmem:[#allocation8 + $0x110] sm:$0xff]  ;;  %v1384_v11 = vld [vmem:[#allocation8 + $0xf8] sm:$0xff] }
  0x12   :  { %239 = vmatpush.msra.mxu3 %v1355_v2  ;;  %v1382_v10 = vld [vmem:[#allocation8 + $0xf0] sm:$0xff]  ;;  %v1386_v12 = vld [vmem:[#allocation8 + $0x178] sm:$0xff]  ;;  %v1391_v13 = vld [vmem:[#allocation8 + $0x160] sm:$0xff] }
  0x13   :  { %124 = vmatpush.msra.mxu0 %v1361_v4  ;;  %144 = vmatpush.msra.mxu1 %v1363_v5  ;;  %v1393_v14 = vld [vmem:[#allocation8 + $0xd8] sm:$0xff]  ;;  %v1395_v15 = vld [vmem:[#allocation8 + $0xe0] sm:$0xff]  ;;  %v1401_v16 = vld [vmem:[#allocation8 + $0x148] sm:$0xff] }
  0x14   :  { %240 = vmatpush.msra.mxu3 %v1361_v4  ;;  %162 = vmatpush.msra.mxu2 %v1386_v12  ;;  %v1403_v17 = vld [vmem:[#allocation8 + $0xc0] sm:$0xff]  ;;  %v1405_v18 = vld [vmem:[#allocation8 + $0xc8] sm:$0xff]  ;;  %v1411_v19 = vld [vmem:[#allocation8 + $0x130] sm:$0xff] }
  0x15   :  { %125 = vmatpush.msra.mxu0 %v1368_v6  ;;  %145 = vmatpush.msra.mxu1 %v1370_v7  ;;  %v1413_v20 = vld [vmem:[#allocation8 + $0xa8] sm:$0xff]  ;;  %v1415_v21 = vld [vmem:[#allocation8 + $0xb0] sm:$0xff]  ;;  %v1421_v22 = vld [vmem:[#allocation8 + $0x118] sm:$0xff] }
  0x16   :  { %241 = vmatpush.msra.mxu3 %v1368_v6  ;;  %163 = vmatpush.msra.mxu2 %v1391_v13  ;;  %v1423_v23 = vld [vmem:[#allocation8 + $0x90] sm:$0xff]  ;;  %v1425_v24 = vld [vmem:[#allocation8 + $0x98] sm:$0xff]  ;;  %v1431_v25 = vld [vmem:[#allocation8 + $0x100] sm:$0xff] }
  0x17   :  { %126 = vmatpush.msra.mxu0 %v1375_v8  ;;  %146 = vmatpush.msra.mxu1 %v1377_v9  ;;  %v1433_v26 = vld [vmem:[#allocation8 + $0x78] sm:$0xff]  ;;  %v1435_v27 = vld [vmem:[#allocation8 + $0x80] sm:$0xff]  ;;  %v1441_v28 = vld [vmem:[#allocation8 + $0xe8] sm:$0xff] }
  0x18   :  { %242 = vmatpush.msra.mxu3 %v1375_v8  ;;  %164 = vmatpush.msra.mxu2 %v1401_v16  ;;  %v1443_v29 = vld [vmem:[#allocation8 + $0x60] sm:$0xff]  ;;  %v1445_v30 = vld [vmem:[#allocation8 + $0x68] sm:$0xff]  ;;  %v1451_v31 = vld [vmem:[#allocation8 + $0xd0] sm:$0xff] }
  0x19   :  { %127 = vmatpush.msra.mxu0 %v1382_v10  ;;  %147 = vmatpush.msra.mxu1 %v1384_v11  ;;  %v1453_v32 = vld [vmem:[#allocation8 + $0x48] sm:$0xff]  ;;  %v1455_v33 = vld [vmem:[#allocation8 + $0x50] sm:$0xff]  ;;  %v1461_v34 = vld [vmem:[#allocation8 + $0xb8] sm:$0xff] }
  0x1a   :  { %243 = vmatpush.msra.mxu3 %v1382_v10  ;;  %165 = vmatpush.msra.mxu2 %v1411_v19  ;;  %v1463_v35 = vld [vmem:[#allocation8 + $0x30] sm:$0xff]  ;;  %v1465_v36 = vld [vmem:[#allocation8 + $0x38] sm:$0xff]  ;;  %v1471_v37 = vld [vmem:[#allocation8 + $0xa0] sm:$0xff] }
  0x1b   :  { %128 = vmatpush.msra.mxu0 %v1393_v14  ;;  %148 = vmatpush.msra.mxu1 %v1395_v15  ;;  %1914 = vst [vmem:[#allocation13_spill] sm:$0xff] %v1463_v35  ;;  %v1473_v38 = vld [vmem:[#allocation8 + $0x18] sm:$0xff]  ;;  %v1475_v39 = vld [vmem:[#allocation8 + $0x20] sm:$0xff]  ;;  %v1481_v40 = vld [vmem:[#allocation8 + $0x88] sm:$0xff] }
  0x1c   :  { %244 = vmatpush.msra.mxu3 %v1393_v14  ;;  %166 = vmatpush.msra.mxu2 %v1421_v22  ;;  %1915 = vst [vmem:[#allocation14_spill] sm:$0xff] %v1465_v36  ;;  %v1483_v41 = vld [vmem:[#allocation8] sm:$0xff]  ;;  %v1485_v42 = vld [vmem:[#allocation8 + $0x8] sm:$0xff]  ;;  %v1491_v43 = vld [vmem:[#allocation6] sm:$0xff] }
  0x1d   :  { %129 = vmatpush.msra.mxu0 %v1403_v17  ;;  %149 = vmatpush.msra.mxu1 %v1405_v18  ;;  %1916 = vst [vmem:[#allocation15_spill] sm:$0xff] %v1473_v38  ;;  %v1494_v44 = vld [vmem:[#allocation8 + $0x70] sm:$0xff]  ;;  %v1501_v45 = vld [vmem:[#allocation8 + $0x58] sm:$0xff]  ;;  %v1505_v46 = vld [vmem:[#allocation8 + $0x40] sm:$0xff] }
  0x1e   :  { %245 = vmatpush.msra.mxu3 %v1403_v17  ;;  %167 = vmatpush.msra.mxu2 %v1431_v25  ;;  %1917 = vst [vmem:[#allocation16_spill] sm:$0xff] %v1475_v39  ;;  %v1511_v47 = vld [vmem:[#allocation8 + $0x28] sm:$0xff]  ;;  %v1517_v48 = vld [vmem:[#allocation8 + $0x10] sm:$0xff]  ;;  %v119_v49 = vld [vmem:[#allocation3] sm:$0xff] }
  0x1f   :  { %130 = vmatpush.msra.mxu0 %v1413_v20  ;;  %150 = vmatpush.msra.mxu1 %v1415_v21  ;;  %1918 = vst [vmem:[#allocation17_spill] sm:$0xff] %v1483_v41  ;;  %v120_v50 = vld [vmem:[#allocation3 + $0x8] sm:$0xff] }
  0x20   :  { %246 = vmatpush.msra.mxu3 %v1413_v20  ;;  %168 = vmatpush.msra.mxu2 %v1441_v28  ;;  %1919 = vst [vmem:[#allocation18_spill] sm:$0xff] %v1485_v42 }
  0x21   :  { %131 = vmatpush.msra.mxu0 %v1423_v23  ;;  %151 = vmatpush.msra.mxu1 %v1425_v24  ;;  %1920 = vst [vmem:[#allocation19_spill] sm:$0xff] %v1511_v47 }
  0x22   :  { %247 = vmatpush.msra.mxu3 %v1423_v23  ;;  %169 = vmatpush.msra.mxu2 %v1451_v31  ;;  %1921 = vst [vmem:[#allocation20_spill] sm:$0xff] %v1517_v48 }
  0x23   :  { %132 = vmatpush.msra.mxu0 %v1433_v26  ;;  %152 = vmatpush.msra.mxu1 %v1435_v27 }
  0x24   :  { %248 = vmatpush.msra.mxu3 %v1433_v26  ;;  %170 = vmatpush.msra.mxu2 %v1461_v34 }
  0x25   :  { %133 = vmatpush.msra.mxu0 %v1443_v29  ;;  %153 = vmatpush.msra.mxu1 %v1445_v30 }
  0x26   :  { %249 = vmatpush.msra.mxu3 %v1443_v29  ;;  %171 = vmatpush.msra.mxu2 %v1471_v37 }
  0x27   :  { %134 = vmatpush.msra.mxu0 %v1453_v32  ;;  %154 = vmatpush.msra.mxu1 %v1455_v33 }
  0x28   :  { %250 = vmatpush.msra.mxu3 %v1453_v32  ;;  %172 = vmatpush.msra.mxu2 %v1481_v40 }
  0x29   :  { %135 = vmatpush.msra.mxu0 %v1463_v35  ;;  %155 = vmatpush.msra.mxu1 %v1465_v36 }
  0x2a   :  { %251 = vmatpush.msra.mxu3 %v1463_v35  ;;  %173 = vmatpush.msra.mxu2 %v1494_v44 }
  0x2b   :  { %136 = vmatpush.msra.mxu0 %v1473_v38  ;;  %156 = vmatpush.msra.mxu1 %v1475_v39 }
  0x2c   :  { %252 = vmatpush.msra.mxu3 %v1473_v38  ;;  %174 = vmatpush.msra.mxu2 %v1501_v45 }
  0x2d   :  { %137 = vmatpush.msra.mxu0 %v1483_v41  ;;  %157 = vmatpush.msra.mxu1 %v1485_v42 }
  0x2e   :  { %138 = vmatmul.f32.vlgmr.msra.gmra.mxu0 %v1491_v43  ;;  %158 = vmatmul.f32.vlgmr.msra.gmra.mxu1 %v1491_v43 }
  0x2f   :  { %258 = vmatpush.msrb.mxu0 %v1353_v1  ;;  %278 = vmatpush.msrb.mxu1 %v1386_v12 }
  0x30   :  { %253 = vmatpush.msra.mxu3 %v1483_v41  ;;  %175 = vmatpush.msra.mxu2 %v1505_v46 }
  0x31   :  { %259 = vmatpush.msrb.mxu0 %v1359_v3  ;;  %279 = vmatpush.msrb.mxu1 %v1391_v13 }
  0x32   :  { %372 = vmatpush.msrb.mxu3 %v1353_v1  ;;  %176 = vmatpush.msra.mxu2 %v1511_v47 }
  0x33   :  { %260 = vmatpush.msrb.mxu0 %v1363_v5  ;;  %280 = vmatpush.msrb.mxu1 %v1401_v16 }
  0x34   :  { %373 = vmatpush.msrb.mxu3 %v1359_v3  ;;  %177 = vmatpush.msra.mxu2 %v1517_v48 }
  0x35   :  { %261 = vmatpush.msrb.mxu0 %v1370_v7  ;;  %281 = vmatpush.msrb.mxu1 %v1411_v19 }
  0x36   :  { %374 = vmatpush.msrb.mxu3 %v1363_v5  ;;  %178 = vmatmul.f32.vlgmr.msra.gmra.mxu2 %v1491_v43 }
  0x37   :  { %262 = vmatpush.msrb.mxu0 %v1377_v9  ;;  %282 = vmatpush.msrb.mxu1 %v1421_v22 }
  0x38   :  { %352 = vmatpush.msrb.mxu2 %v1351_v0  ;;  %375 = vmatpush.msrb.mxu3 %v1370_v7 }
  0x39   :  { %263 = vmatpush.msrb.mxu0 %v1384_v11  ;;  %283 = vmatpush.msrb.mxu1 %v1431_v25 }
  0x3a   :  { %353 = vmatpush.msrb.mxu2 %v1355_v2  ;;  %376 = vmatpush.msrb.mxu3 %v1377_v9 }
  0x3b   :  { %264 = vmatpush.msrb.mxu0 %v1395_v15  ;;  %284 = vmatpush.msrb.mxu1 %v1441_v28 }
  0x3c   :  { %354 = vmatpush.msrb.mxu2 %v1361_v4  ;;  %377 = vmatpush.msrb.mxu3 %v1384_v11 }
  0x3d   :  { %265 = vmatpush.msrb.mxu0 %v1405_v18  ;;  %285 = vmatpush.msrb.mxu1 %v1451_v31 }
  0x3e   :  { %355 = vmatpush.msrb.mxu2 %v1368_v6  ;;  %378 = vmatpush.msrb.mxu3 %v1395_v15 }
  0x3f   :  { %266 = vmatpush.msrb.mxu0 %v1415_v21  ;;  %286 = vmatpush.msrb.mxu1 %v1461_v34 }
  0x40   :  { %356 = vmatpush.msrb.mxu2 %v1375_v8  ;;  %379 = vmatpush.msrb.mxu3 %v1405_v18 }
  0x41   :  { %267 = vmatpush.msrb.mxu0 %v1425_v24  ;;  %287 = vmatpush.msrb.mxu1 %v1471_v37 }
  0x42   :  { %357 = vmatpush.msrb.mxu2 %v1382_v10  ;;  %380 = vmatpush.msrb.mxu3 %v1415_v21 }
  0x43   :  { %268 = vmatpush.msrb.mxu0 %v1435_v27  ;;  %288 = vmatpush.msrb.mxu1 %v1481_v40 }
  0x44   :  { %358 = vmatpush.msrb.mxu2 %v1393_v14  ;;  %381 = vmatpush.msrb.mxu3 %v1425_v24 }
  0x45   :  { %269 = vmatpush.msrb.mxu0 %v1445_v30  ;;  %289 = vmatpush.msrb.mxu1 %v1494_v44 }
  0x46   :  { %359 = vmatpush.msrb.mxu2 %v1403_v17  ;;  %382 = vmatpush.msrb.mxu3 %v1435_v27 }
  0x47   :  { %270 = vmatpush.msrb.mxu0 %v1455_v33  ;;  %290 = vmatpush.msrb.mxu1 %v1501_v45 }
  0x48   :  { %360 = vmatpush.msrb.mxu2 %v1413_v20  ;;  %383 = vmatpush.msrb.mxu3 %v1445_v30 }
  0x49   :  { %271 = vmatpush.msrb.mxu0 %v1465_v36  ;;  %291 = vmatpush.msrb.mxu1 %v1505_v46 }
  0x4a   :  { %361 = vmatpush.msrb.mxu2 %v1423_v23  ;;  %384 = vmatpush.msrb.mxu3 %v1455_v33 }
  0x4b   :  { %272 = vmatpush.msrb.mxu0 %v1475_v39  ;;  %292 = vmatpush.msrb.mxu1 %v1511_v47 }
  0x4c   :  { %362 = vmatpush.msrb.mxu2 %v1433_v26  ;;  %385 = vmatpush.msrb.mxu3 %v1465_v36 }
  0x4d   :  { %273 = vmatpush.msrb.mxu0 %v1485_v42  ;;  %293 = vmatpush.msrb.mxu1 %v1517_v48 }
  0x4e   :  { %363 = vmatpush.msrb.mxu2 %v1443_v29  ;;  %386 = vmatpush.msrb.mxu3 %v1475_v39 }
  0x4f   :  { %392 = vmatpush.msra.mxu0 %v1386_v12  ;;  %466 = vmatpush.msra.mxu1 %v1351_v0 }
  0x50   :  { %364 = vmatpush.msrb.mxu2 %v1453_v32  ;;  %387 = vmatpush.msrb.mxu3 %v1485_v42 }
  0x51   :  { %393 = vmatpush.msra.mxu0 %v1391_v13  ;;  %467 = vmatpush.msra.mxu1 %v1355_v2 }
  0x52   :  { %365 = vmatpush.msrb.mxu2 %v1463_v35 }
  0x53   :  { %394 = vmatpush.msra.mxu0 %v1401_v16  ;;  %468 = vmatpush.msra.mxu1 %v1361_v4 }
  0x54   :  { %366 = vmatpush.msrb.mxu2 %v1473_v38 }
  0x55   :  { %395 = vmatpush.msra.mxu0 %v1411_v19  ;;  %469 = vmatpush.msra.mxu1 %v1368_v6 }
  0x56   :  { %367 = vmatpush.msrb.mxu2 %v1483_v41 }
  0x57   :  { %396 = vmatpush.msra.mxu0 %v1421_v22  ;;  %470 = vmatpush.msra.mxu1 %v1375_v8 }
  0x58   :  { %486 = vmatpush.msra.mxu2 %v1353_v1 }
  0x59   :  { %397 = vmatpush.msra.mxu0 %v1431_v25  ;;  %471 = vmatpush.msra.mxu1 %v1382_v10 }
  0x5a   :  { %487 = vmatpush.msra.mxu2 %v1359_v3 }
  0x5b   :  { %398 = vmatpush.msra.mxu0 %v1441_v28  ;;  %472 = vmatpush.msra.mxu1 %v1393_v14 }
  0x5c   :  { %488 = vmatpush.msra.mxu2 %v1363_v5 }
  0x5d   :  { %399 = vmatpush.msra.mxu0 %v1451_v31  ;;  %473 = vmatpush.msra.mxu1 %v1403_v17 }
  0x5e   :  { %489 = vmatpush.msra.mxu2 %v1370_v7 }
  0x5f   :  { %400 = vmatpush.msra.mxu0 %v1461_v34  ;;  %474 = vmatpush.msra.mxu1 %v1413_v20 }
  0x60   :  { %490 = vmatpush.msra.mxu2 %v1377_v9 }
  0x61   :  { %401 = vmatpush.msra.mxu0 %v1471_v37  ;;  %475 = vmatpush.msra.mxu1 %v1423_v23 }
  0x62   :  { %491 = vmatpush.msra.mxu2 %v1384_v11 }
  0x63   :  { %402 = vmatpush.msra.mxu0 %v1481_v40  ;;  %476 = vmatpush.msra.mxu1 %v1433_v26 }
  0x64   :  { %492 = vmatpush.msra.mxu2 %v1395_v15 }
  0x65   :  { %403 = vmatpush.msra.mxu0 %v1494_v44  ;;  %477 = vmatpush.msra.mxu1 %v1443_v29 }
  0x66   :  { %493 = vmatpush.msra.mxu2 %v1405_v18 }
  0x67   :  { %404 = vmatpush.msra.mxu0 %v1501_v45  ;;  %478 = vmatpush.msra.mxu1 %v1453_v32 }
  0x68   :  { %494 = vmatpush.msra.mxu2 %v1415_v21 }
  0x69   :  { %405 = vmatpush.msra.mxu0 %v1505_v46  ;;  %479 = vmatpush.msra.mxu1 %v1463_v35 }
  0x6a   :  { %495 = vmatpush.msra.mxu2 %v1425_v24 }
  0x6b   :  { %406 = vmatpush.msra.mxu0 %v1511_v47  ;;  %480 = vmatpush.msra.mxu1 %v1473_v38  ;;  %v121_v38 = vld [vmem:[#allocation3 + $0x10] sm:$0xff] }
  0x6c   :  { %496 = vmatpush.msra.mxu2 %v1435_v27 }
  0x6d   :  { %407 = vmatpush.msra.mxu0 %v1517_v48  ;;  %481 = vmatpush.msra.mxu1 %v1483_v41  ;;  %v1631_v41 = vld [vmem:[%s1896_s3] ss:$0 sm:$0xff] }
  0x6e   :  { %497 = vmatpush.msra.mxu2 %v1445_v30 }
  0x70   :  { %498 = vmatpush.msra.mxu2 %v1455_v33 }
  0x72   :  { %499 = vmatpush.msra.mxu2 %v1465_v36 }
  0x74   :  { %500 = vmatpush.msra.mxu2 %v1475_v39 }
  0x76   :  { %501 = vmatpush.msra.mxu2 %v1485_v42 }
  0xab   :  { %v139_v51 = vpop.f32.mrf.mxu0  ;;  %v159_v52 = vpop.f32.mrf.mxu1 }
  0xac   :  { %v186_v53 = vadd.f32 %v139_v51, %v119_v49  ;;  %v206_v54 = vadd.f32 %v159_v52, %v120_v50 }
  0xae   :  { %v1053_v55 = vmul.f32 -1.442695, %v186_v53  ;;  %v1054_v56 = vmul.f32 -1.442695, %v206_v54 }
  0xb0   :  { %1078 = vpow2.f32 %v1053_v55 }
  0xb1   :  { %1080 = vpow2.f32 %v1054_v56 }
  0xb6   :  { %v1079_v57 = vpop.eup %1078 }
  0xb7   :  { %v1081_v58 = vpop.eup %1080  ;;  %v190_v59 = vadd.f32 1.0, %v1079_v57 }
  0xb8   :  { %v210_v60 = vadd.f32 1.0, %v1081_v58 }
  0xb9   :  { %1082 = vrcp.f32 %v190_v59  ;;  %v179_v51 = vpop.f32.mrf.mxu2  ;;  %v202_v52 = vand.u32 2147483648, %v190_v59  ;;  %v200_v54 = vand.u32 2147483647, %v190_v59  ;;  %vm196_vm1 = vweird.f32 %v190_v59 }
  0xba   :  { %1084 = vrcp.f32 %v210_v60  ;;  %v185_v56 = vadd.f32 %v1631_v41, %v179_v51  ;;  %vm216_vm4 = vweird.f32 %v210_v60  ;;  %v220_v36 = vand.u32 2147483647, %v210_v60 }
  0xbb   :  { %v203_v58 = vor.u32 1.1754944e-38, %v202_v52  ;;  %vm201_vm3 = vcmp.eq.f32.partialorder %v200_v54, 8.507059e+37 }
  0xbc   :  { %vm221_vm7 = vcmp.eq.f32.partialorder %v220_v36, 8.507059e+37  ;;  %v1923_v36 = vld [vmem:[#allocation14_spill] sm:$0xff] }
  0xbf   :  { %v1083_v61 = vpop.eup %1082 }
  0xc0   :  { %v1085_v62 = vpop.eup %1084  ;;  %v192_v63 = vmul.f32 %v1083_v61, %v190_v59  ;;  %vm197_vm0 = vweird.f32 %v1083_v61 }
  0xc1   :  { %v212_v42 = vmul.f32 %v1085_v62, %v210_v60  ;;  %vm198_vm2 = vmor %vm196_vm1, %vm197_vm0  ;;  %vm217_vm5 = vweird.f32 %v1085_v62 }
  0xc2   :  { %v193_v49 = vsub.f32 1.0, %v192_v63  ;;  %vm218_vm6 = vmor %vm216_vm4, %vm217_vm5 }
  0xc3   :  { %v213_v50 = vsub.f32 1.0, %v212_v42  ;;  %v222_v42 = vand.u32 2147483648, %v210_v60  ;;  %v1929_v60 = vld [vmem:[#allocation18_spill] sm:$0xff] }
  0xc4   :  { %v194_v53 = vmul.f32 %v1083_v61, %v193_v49 }
  0xc5   :  { %v214_v55 = vmul.f32 %v1085_v62, %v213_v50  ;;  %v223_v50 = vor.u32 1.1754944e-38, %v222_v42 }
  0xc6   :  { %v195_v57 = vadd.f32 %v1083_v61, %v194_v53 }
  0xc7   :  { %v215_v39 = vadd.f32 %v1085_v62, %v214_v55 }
  0xc8   :  { %v199_v48 = vsel %vm198_vm2, %v1083_v61, %v195_v57 }
  0xc9   :  { %v204_v63 = vsel %vm201_vm3, %v203_v58, %v199_v48  ;;  %v219_v35 = vsel %vm218_vm6, %v1085_v62, %v215_v39  ;;  %v1925_v39 = vld [vmem:[#allocation15_spill] sm:$0xff]  ;;  %v1928_v48 = vld [vmem:[#allocation17_spill] sm:$0xff]  ;;  %v236_v62 = vld [vmem:[#allocation3 + $0x20] sm:$0xff] }
  0xca   :  { %v226_v47 = vmul.f32 %v204_v63, %v185_v56  ;;  %v224_v51 = vsel %vm221_vm7, %v223_v50, %v219_v35  ;;  %v1922_v35 = vld [vmem:[#allocation13_spill] sm:$0xff]  ;;  %v235_v58 = vld [vmem:[#allocation3 + $0x18] sm:$0xff] }
  0xcb   :  { %v229_v59 = vsub.f32 1.0, %v224_v51  ;;  %v231_v61 = vmul.f32 %v224_v51, %v1491_v43  ;;  %v1926_v43 = vld [vmem:[#allocation16_spill] sm:$0xff] }
  0xcc   :  { %v227_v49 = vadd.f32 %v226_v47, %v121_v38  ;;  %v1924_v38 = vld [vmem:[#allocation19_spill] sm:$0xff]  ;;  %v1927_v47 = vld [vmem:[#allocation20_spill] sm:$0xff] }
  0xce   :  { %1086 = vtanh.f32 %v227_v49 }
  0xd4   :  { %v1087_v53 = vpop.eup %1086 }
  0xd5   :  { %v230_v52 = vmul.f32 %v1087_v53, %v229_v59 }
  0xd7   :  { %v1635_v54 = vadd.f32 %v231_v61, %v230_v52 }
  0xd9   :  { %233 = vst [vmem:[#allocation9] sm:$0xff] %v1635_v54  ;;  %254 = vmatmul.f32.vlgmr.msra.gmra.mxu3 %v1635_v54  ;;  %274 = vmatmul.f32.vlgmr.msrb.gmra.mxu0 %v1635_v54 }
  0xda   :  { %294 = vmatmul.f32.vlgmr.msrb.gmra.mxu1 %v1635_v54  ;;  %506 = vmatpush.msra.mxu3 %v1386_v12 }
  0xdb   :  { %580 = vmatpush.msrb.mxu0 %v1351_v0  ;;  %600 = vmatpush.msrb.mxu1 %v1353_v1 }
  0xdc   :  { %507 = vmatpush.msra.mxu3 %v1391_v13 }
  0xdd   :  { %581 = vmatpush.msrb.mxu0 %v1355_v2  ;;  %601 = vmatpush.msrb.mxu1 %v1359_v3 }
  0xde   :  { %508 = vmatpush.msra.mxu3 %v1401_v16 }
  0xdf   :  { %582 = vmatpush.msrb.mxu0 %v1361_v4  ;;  %602 = vmatpush.msrb.mxu1 %v1363_v5 }
  0xe0   :  { %509 = vmatpush.msra.mxu3 %v1411_v19 }
  0xe1   :  { %583 = vmatpush.msrb.mxu0 %v1368_v6  ;;  %603 = vmatpush.msrb.mxu1 %v1370_v7 }
  0xe2   :  { %510 = vmatpush.msra.mxu3 %v1421_v22 }
  0xe3   :  { %584 = vmatpush.msrb.mxu0 %v1375_v8  ;;  %604 = vmatpush.msrb.mxu1 %v1377_v9 }
  0xe4   :  { %511 = vmatpush.msra.mxu3 %v1431_v25 }
  0xe5   :  { %585 = vmatpush.msrb.mxu0 %v1382_v10  ;;  %605 = vmatpush.msrb.mxu1 %v1384_v11 }
  0xe6   :  { %512 = vmatpush.msra.mxu3 %v1441_v28 }
  0xe7   :  { %586 = vmatpush.msrb.mxu0 %v1393_v14  ;;  %606 = vmatpush.msrb.mxu1 %v1395_v15 }
  0xe8   :  { %513 = vmatpush.msra.mxu3 %v1451_v31 }
  0xe9   :  { %587 = vmatpush.msrb.mxu0 %v1403_v17  ;;  %607 = vmatpush.msrb.mxu1 %v1405_v18 }
  0xea   :  { %514 = vmatpush.msra.mxu3 %v1461_v34 }
  0xeb   :  { %588 = vmatpush.msrb.mxu0 %v1413_v20  ;;  %608 = vmatpush.msrb.mxu1 %v1415_v21 }
  0xec   :  { %515 = vmatpush.msra.mxu3 %v1471_v37 }
  0xed   :  { %589 = vmatpush.msrb.mxu0 %v1423_v23  ;;  %609 = vmatpush.msrb.mxu1 %v1425_v24 }
  0xee   :  { %516 = vmatpush.msra.mxu3 %v1481_v40 }
  0xef   :  { %590 = vmatpush.msrb.mxu0 %v1433_v26  ;;  %610 = vmatpush.msrb.mxu1 %v1435_v27 }
  0xf0   :  { %517 = vmatpush.msra.mxu3 %v1494_v44 }
  0xf1   :  { %591 = vmatpush.msrb.mxu0 %v1443_v29  ;;  %611 = vmatpush.msrb.mxu1 %v1445_v30 }
  0xf2   :  { %518 = vmatpush.msra.mxu3 %v1501_v45 }
  0xf3   :  { %592 = vmatpush.msrb.mxu0 %v1453_v32  ;;  %612 = vmatpush.msrb.mxu1 %v1455_v33 }
  0xf4   :  { %519 = vmatpush.msra.mxu3 %v1505_v46 }
  0xf5   :  { %593 = vmatpush.msrb.mxu0 %v1922_v35  ;;  %613 = vmatpush.msrb.mxu1 %v1923_v36 }
  0xf6   :  { %520 = vmatpush.msra.mxu3 %v1924_v38  ;;  %v237_v38 = vld [vmem:[#allocation3 + $0x28] sm:$0xff] }
  0xf7   :  { %594 = vmatpush.msrb.mxu0 %v1925_v39  ;;  %614 = vmatpush.msrb.mxu1 %v1926_v43 }
  0xf8   :  { %521 = vmatpush.msra.mxu3 %v1927_v47 }
  0xf9   :  { %595 = vmatpush.msrb.mxu0 %v1928_v48  ;;  %615 = vmatpush.msrb.mxu1 %v1929_v60 }
 0x156   :  { %v275_v55 = vpop.f32.mrf.mxu0 }
 0x157   :  { %v319_v56 = vadd.f32 %v275_v55, %v236_v62 }
 0x159   :  { %v1056_v57 = vmul.f32 -1.442695, %v319_v56 }
 0x15b   :  { %1088 = vpow2.f32 %v1056_v57 }
 0x15c   :  { %v255_v63 = vpop.f32.mrf.mxu3 }
 0x15d   :  { %v299_v42 = vadd.f32 %v255_v63, %v235_v58  ;;  %v295_v58 = vpop.f32.mrf.mxu1 }
 0x15f   :  { %v1055_v49 = vmul.f32 -1.442695, %v299_v42 }
 0x161   :  { %v1089_v50 = vpop.eup %1088  ;;  %1090 = vpow2.f32 %v1055_v49  ;;  %v298_v49 = vadd.f32 %v1631_v41, %v295_v58 }
 0x162   :  { %v323_v51 = vadd.f32 1.0, %v1089_v50 }
 0x164   :  { %1092 = vrcp.f32 %v323_v51  ;;  %vm329_vm13 = vweird.f32 %v323_v51 }
 0x167   :  { %v1091_v59 = vpop.eup %1090 }
 0x168   :  { %v303_v53 = vadd.f32 1.0, %v1091_v59 }
 0x16a   :  { %1094 = vrcp.f32 %v303_v53  ;;  %v1093_v52 = vpop.eup %1092  ;;  %v315_v62 = vand.u32 2147483648, %v303_v53  ;;  %v313_v56 = vand.u32 2147483647, %v303_v53  ;;  %vm309_vm9 = vweird.f32 %v303_v53 }
 0x16b   :  { %v325_v61 = vmul.f32 %v1093_v52, %v323_v51  ;;  %vm330_vm12 = vweird.f32 %v1093_v52 }
 0x16c   :  { %v316_v42 = vor.u32 1.1754944e-38, %v315_v62  ;;  %vm314_vm11 = vcmp.eq.f32.partialorder %v313_v56, 8.507059e+37  ;;  %vm331_vm14 = vmor %vm329_vm13, %vm330_vm12 }
 0x16d   :  { %v326_v47 = vsub.f32 1.0, %v325_v61  ;;  %v335_v61 = vand.u32 2147483648, %v323_v51 }
 0x16f   :  { %v327_v57 = vmul.f32 %v1093_v52, %v326_v47  ;;  %v336_v35 = vor.u32 1.1754944e-38, %v335_v61 }
 0x170   :  { %v1095_v48 = vpop.eup %1094 }
 0x171   :  { %v305_v60 = vmul.f32 %v1095_v48, %v303_v53  ;;  %vm310_vm8 = vweird.f32 %v1095_v48  ;;  %v328_v59 = vadd.f32 %v1093_v52, %v327_v57  ;;  %v1937_v57 = vld [vmem:[#allocation18_spill] sm:$0xff] }
 0x172   :  { %vm311_vm10 = vmor %vm309_vm9, %vm310_vm8 }
 0x173   :  { %v306_v43 = vsub.f32 1.0, %v305_v60  ;;  %v332_v47 = vsel %vm331_vm14, %v1093_v52, %v328_v59  ;;  %v1936_v52 = vld [vmem:[#allocation17_spill] sm:$0xff] }
 0x175   :  { %v307_v55 = vmul.f32 %v1095_v48, %v306_v43  ;;  %v333_v43 = vand.u32 2147483647, %v323_v51  ;;  %v1935_v51 = vld [vmem:[#allocation20_spill] sm:$0xff] }
 0x177   :  { %v308_v63 = vadd.f32 %v1095_v48, %v307_v55  ;;  %vm334_vm15 = vcmp.eq.f32.partialorder %v333_v43, 8.507059e+37 }
 0x178   :  { %v337_v53 = vsel %vm334_vm15, %v336_v35, %v332_v47  ;;  %v1931_v35 = vld [vmem:[#allocation14_spill] sm:$0xff] }
 0x179   :  { %v312_v50 = vsel %vm311_vm10, %v1095_v48, %v308_v63  ;;  %v342_v62 = vsub.f32 1.0, %v337_v53  ;;  %v344_v48 = vmul.f32 %v337_v53, %v1635_v54  ;;  %v1930_v54 = vld [vmem:[#allocation13_spill] sm:$0xff]  ;;  %v349_v63 = vld [vmem:[#allocation3 + $0x30] sm:$0xff] }
 0x17a   :  { %v317_v39 = vsel %vm314_vm11, %v316_v42, %v312_v50  ;;  %v350_v42 = vld [vmem:[#allocation3 + $0x38] sm:$0xff] }
 0x17b   :  { %v339_v60 = vmul.f32 %v317_v39, %v298_v49  ;;  %v1934_v39 = vld [vmem:[#allocation16_spill] sm:$0xff] }
 0x17d   :  { %v340_v36 = vadd.f32 %v339_v60, %v237_v38  ;;  %v1933_v38 = vld [vmem:[#allocation15_spill] sm:$0xff] }
 0x17f   :  { %1096 = vtanh.f32 %v340_v36  ;;  %v1932_v36 = vld [vmem:[#allocation19_spill] sm:$0xff] }
 0x185   :  { %v1097_v55 = vpop.eup %1096 }
 0x186   :  { %v343_v58 = vmul.f32 %v1097_v55, %v342_v62 }
 0x188   :  { %v1691_v56 = vadd.f32 %v344_v48, %v343_v58 }
 0x18a   :  { %347 = vst [vmem:[#allocation9 + $0x8] sm:$0xff] %v1691_v56  ;;  %368 = vmatmul.f32.vlgmr.msrb.gmra.mxu2 %v1691_v56  ;;  %388 = vmatmul.f32.vlgmr.msrb.gmra.mxu3 %v1691_v56 }
 0x18b   :  { %408 = vmatmul.f32.vlgmr.msra.gmra.mxu0 %v1691_v56  ;;  %620 = vmatpush.msrb.mxu2 %v1386_v12 }
 0x18c   :  { %694 = vmatpush.msrb.mxu3 %v1351_v0  ;;  %714 = vmatpush.msra.mxu0 %v1353_v1 }
 0x18d   :  { %621 = vmatpush.msrb.mxu2 %v1391_v13 }
 0x18e   :  { %695 = vmatpush.msrb.mxu3 %v1355_v2  ;;  %715 = vmatpush.msra.mxu0 %v1359_v3 }
 0x18f   :  { %622 = vmatpush.msrb.mxu2 %v1401_v16 }
 0x190   :  { %696 = vmatpush.msrb.mxu3 %v1361_v4  ;;  %716 = vmatpush.msra.mxu0 %v1363_v5 }
 0x191   :  { %623 = vmatpush.msrb.mxu2 %v1411_v19 }
 0x192   :  { %697 = vmatpush.msrb.mxu3 %v1368_v6  ;;  %717 = vmatpush.msra.mxu0 %v1370_v7 }
 0x193   :  { %624 = vmatpush.msrb.mxu2 %v1421_v22 }
 0x194   :  { %698 = vmatpush.msrb.mxu3 %v1375_v8  ;;  %718 = vmatpush.msra.mxu0 %v1377_v9 }
 0x195   :  { %625 = vmatpush.msrb.mxu2 %v1431_v25 }
 0x196   :  { %699 = vmatpush.msrb.mxu3 %v1382_v10  ;;  %719 = vmatpush.msra.mxu0 %v1384_v11 }
 0x197   :  { %626 = vmatpush.msrb.mxu2 %v1441_v28 }
 0x198   :  { %700 = vmatpush.msrb.mxu3 %v1393_v14  ;;  %720 = vmatpush.msra.mxu0 %v1395_v15 }
 0x199   :  { %627 = vmatpush.msrb.mxu2 %v1451_v31 }
 0x19a   :  { %701 = vmatpush.msrb.mxu3 %v1403_v17  ;;  %721 = vmatpush.msra.mxu0 %v1405_v18 }
 0x19b   :  { %628 = vmatpush.msrb.mxu2 %v1461_v34 }
 0x19c   :  { %702 = vmatpush.msrb.mxu3 %v1413_v20  ;;  %722 = vmatpush.msra.mxu0 %v1415_v21 }
 0x19d   :  { %629 = vmatpush.msrb.mxu2 %v1471_v37 }
 0x19e   :  { %703 = vmatpush.msrb.mxu3 %v1423_v23  ;;  %723 = vmatpush.msra.mxu0 %v1425_v24 }
 0x19f   :  { %630 = vmatpush.msrb.mxu2 %v1481_v40 }
 0x1a0   :  { %704 = vmatpush.msrb.mxu3 %v1433_v26  ;;  %724 = vmatpush.msra.mxu0 %v1435_v27 }
 0x1a1   :  { %631 = vmatpush.msrb.mxu2 %v1494_v44 }
 0x1a2   :  { %705 = vmatpush.msrb.mxu3 %v1443_v29  ;;  %725 = vmatpush.msra.mxu0 %v1445_v30 }
 0x1a3   :  { %632 = vmatpush.msrb.mxu2 %v1501_v45 }
 0x1a4   :  { %706 = vmatpush.msrb.mxu3 %v1453_v32  ;;  %726 = vmatpush.msra.mxu0 %v1455_v33 }
 0x1a5   :  { %633 = vmatpush.msrb.mxu2 %v1505_v46 }
 0x1a6   :  { %707 = vmatpush.msrb.mxu3 %v1930_v54  ;;  %727 = vmatpush.msra.mxu0 %v1931_v35 }
 0x1a7   :  { %634 = vmatpush.msrb.mxu2 %v1932_v36 }
 0x1a8   :  { %708 = vmatpush.msrb.mxu3 %v1933_v38  ;;  %728 = vmatpush.msra.mxu0 %v1934_v39 }
 0x1a9   :  { %635 = vmatpush.msrb.mxu2 %v1935_v51 }
 0x1aa   :  { %709 = vmatpush.msrb.mxu3 %v1936_v52  ;;  %729 = vmatpush.msra.mxu0 %v1937_v57 }
 0x20d   :  { %v369_v49 = vpop.f32.mrf.mxu2  ;;  %v389_v50 = vpop.f32.mrf.mxu3 }
 0x20e   :  { %v413_v59 = vadd.f32 %v369_v49, %v349_v63  ;;  %v433_v61 = vadd.f32 %v389_v50, %v350_v42  ;;  %v409_v42 = vpop.f32.mrf.mxu0 }
 0x210   :  { %v1057_v60 = vmul.f32 -1.442695, %v413_v59  ;;  %v1058_v43 = vmul.f32 -1.442695, %v433_v61  ;;  %v412_v61 = vadd.f32 %v1631_v41, %v409_v42 }
 0x212   :  { %1098 = vpow2.f32 %v1057_v60 }
 0x213   :  { %1100 = vpow2.f32 %v1058_v43 }
 0x218   :  { %v1099_v47 = vpop.eup %1098 }
 0x219   :  { %v1101_v53 = vpop.eup %1100  ;;  %v417_v62 = vadd.f32 1.0, %v1099_v47 }
 0x21a   :  { %v437_v55 = vadd.f32 1.0, %v1101_v53  ;;  %v351_v53 = vld [vmem:[#allocation3 + $0x40] sm:$0xff] }
 0x21b   :  { %1102 = vrcp.f32 %v417_v62  ;;  %v429_v39 = vand.u32 2147483648, %v417_v62  ;;  %v427_v63 = vand.u32 2147483647, %v417_v62  ;;  %vm423_vm1 = vweird.f32 %v417_v62 }
 0x21c   :  { %1104 = vrcp.f32 %v437_v55  ;;  %v449_v35 = vand.u32 2147483648, %v437_v55  ;;  %vm443_vm5 = vweird.f32 %v437_v55 }
 0x21d   :  { %v430_v59 = vor.u32 1.1754944e-38, %v429_v39  ;;  %vm428_vm3 = vcmp.eq.f32.partialorder %v427_v63, 8.507059e+37 }
 0x221   :  { %v1103_v58 = vpop.eup %1102 }
 0x222   :  { %v1105_v48 = vpop.eup %1104  ;;  %v419_v52 = vmul.f32 %v1103_v58, %v417_v62  ;;  %vm424_vm0 = vweird.f32 %v1103_v58 }
 0x223   :  { %v439_v57 = vmul.f32 %v1105_v48, %v437_v55  ;;  %vm425_vm2 = vmor %vm423_vm1, %vm424_vm0  ;;  %vm444_vm4 = vweird.f32 %v1105_v48 }
 0x224   :  { %v420_v51 = vsub.f32 1.0, %v419_v52  ;;  %vm445_vm6 = vmor %vm443_vm5, %vm444_vm4 }
 0x225   :  { %v440_v38 = vsub.f32 1.0, %v439_v57 }
 0x226   :  { %v421_v36 = vmul.f32 %v1103_v58, %v420_v51  ;;  %v447_v51 = vand.u32 2147483647, %v437_v55 }
 0x227   :  { %v441_v49 = vmul.f32 %v1105_v48, %v440_v38  ;;  %v450_v38 = vor.u32 1.1754944e-38, %v449_v35 }
 0x228   :  { %v422_v50 = vadd.f32 %v1103_v58, %v421_v36  ;;  %vm448_vm7 = vcmp.eq.f32.partialorder %v447_v51, 8.507059e+37  ;;  %v1162_v51 = vld [vmem:[#allocation8 + $0x150] sm:$0xff] }
 0x229   :  { %v442_v47 = vadd.f32 %v1105_v48, %v441_v49 }
 0x22a   :  { %v426_v60 = vsel %vm425_vm2, %v1103_v58, %v422_v50 }
 0x22b   :  { %v431_v43 = vsel %vm428_vm3, %v430_v59, %v426_v60  ;;  %v446_v54 = vsel %vm445_vm6, %v1105_v48, %v442_v47  ;;  %v1159_v47 = vld [vmem:[#allocation8 + $0x168] sm:$0xff] }
 0x22c   :  { %v453_v52 = vmul.f32 %v431_v43, %v412_v61  ;;  %v451_v36 = vsel %vm448_vm7, %v450_v38, %v446_v54  ;;  %v1809_v43 = vld [vmem:[#allocation8 + $0x178] sm:$0xff]  ;;  %v1815_v38 = vld [vmem:[#allocation8 + $0x148] sm:$0xff] }
 0x22d   :  { %v456_v39 = vsub.f32 1.0, %v451_v36  ;;  %v458_v58 = vmul.f32 %v451_v36, %v1691_v56  ;;  %v1165_v36 = vld [vmem:[#allocation8 + $0x138] sm:$0xff] }
 0x22e   :  { %v454_v57 = vadd.f32 %v453_v52, %v351_v53  ;;  %v1160_v53 = vld [vmem:[#allocation8 + $0x170] sm:$0xff]  ;;  %v1812_v52 = vld [vmem:[#allocation8 + $0x160] sm:$0xff] }
 0x230   :  { %1106 = vtanh.f32 %v454_v57  ;;  %v1163_v57 = vld [vmem:[#allocation8 + $0x158] sm:$0xff] }
 0x236   :  { %v1107_v62 = vpop.eup %1106 }
 0x237   :  { %v457_v42 = vmul.f32 %v1107_v62, %v456_v39  ;;  %v1166_v39 = vld [vmem:[#allocation8 + $0x140] sm:$0xff]  ;;  %v1818_v62 = vld [vmem:[#allocation8 + $0x130] sm:$0xff] }
 0x239   :  { %v1747_v63 = vadd.f32 %v458_v58, %v457_v42  ;;  %v1168_v42 = vld [vmem:[#allocation8 + $0x120] sm:$0xff]  ;;  %v1169_v58 = vld [vmem:[#allocation8 + $0x128] sm:$0xff] }
 0x23b   :  { %461 = vst [vmem:[#allocation9 + $0x10] sm:$0xff] %v1747_v63  ;;  %482 = vmatmul.f32.vlgmr.msra.gmra.mxu1 %v1747_v63  ;;  %502 = vmatmul.f32.vlgmr.msra.gmra.mxu2 %v1747_v63 }
 0x23c   :  { %522 = vmatmul.f32.vlgmr.msra.gmra.mxu3 %v1747_v63  ;;  %734 = vmatpush.msra.mxu1 %v1386_v12  ;;  %v464_v12 = vld [vmem:[#allocation3 + $0x50] sm:$0xff] }
 0x23d   :  { %808 = vmatpush.msra.mxu2 %v1351_v0  ;;  %828 = vmatpush.msra.mxu3 %v1353_v1  ;;  %v1938_v0 = vld [vmem:[#allocation13_spill] sm:$0xff]  ;;  %v1939_v1 = vld [vmem:[#allocation14_spill] sm:$0xff] }
 0x23e   :  { %735 = vmatpush.msra.mxu1 %v1391_v13 }
 0x23f   :  { %809 = vmatpush.msra.mxu2 %v1355_v2  ;;  %829 = vmatpush.msra.mxu3 %v1359_v3  ;;  %v1940_v2 = vld [vmem:[#allocation19_spill] sm:$0xff] }
 0x240   :  { %736 = vmatpush.msra.mxu1 %v1401_v16  ;;  %v1941_v3 = vld [vmem:[#allocation15_spill] sm:$0xff] }
 0x241   :  { %810 = vmatpush.msra.mxu2 %v1361_v4  ;;  %830 = vmatpush.msra.mxu3 %v1363_v5  ;;  %v1942_v4 = vld [vmem:[#allocation16_spill] sm:$0xff] }
 0x242   :  { %737 = vmatpush.msra.mxu1 %v1411_v19  ;;  %v1943_v5 = vld [vmem:[#allocation20_spill] sm:$0xff] }
 0x243   :  { %811 = vmatpush.msra.mxu2 %v1368_v6  ;;  %831 = vmatpush.msra.mxu3 %v1370_v7  ;;  %v1944_v6 = vld [vmem:[#allocation17_spill] sm:$0xff]  ;;  %v1945_v7 = vld [vmem:[#allocation18_spill] sm:$0xff] }
 0x244   :  { %738 = vmatpush.msra.mxu1 %v1421_v22 }
 0x245   :  { %812 = vmatpush.msra.mxu2 %v1375_v8  ;;  %832 = vmatpush.msra.mxu3 %v1377_v9  ;;  %v463_v8 = vld [vmem:[#allocation3 + $0x48] sm:$0xff] }
 0x246   :  { %739 = vmatpush.msra.mxu1 %v1431_v25 }
 0x247   :  { %813 = vmatpush.msra.mxu2 %v1382_v10  ;;  %833 = vmatpush.msra.mxu3 %v1384_v11 }
 0x248   :  { %740 = vmatpush.msra.mxu1 %v1441_v28 }
 0x249   :  { %814 = vmatpush.msra.mxu2 %v1393_v14  ;;  %834 = vmatpush.msra.mxu3 %v1395_v15 }
 0x24a   :  { %741 = vmatpush.msra.mxu1 %v1451_v31 }
 0x24b   :  { %815 = vmatpush.msra.mxu2 %v1403_v17  ;;  %835 = vmatpush.msra.mxu3 %v1405_v18 }
 0x24c   :  { %742 = vmatpush.msra.mxu1 %v1461_v34  ;;  %v465_v34 = vld [vmem:[#allocation3 + $0x58] sm:$0xff] }
 0x24d   :  { %816 = vmatpush.msra.mxu2 %v1413_v20  ;;  %836 = vmatpush.msra.mxu3 %v1415_v21 }
 0x24e   :  { %743 = vmatpush.msra.mxu1 %v1471_v37 }
 0x24f   :  { %817 = vmatpush.msra.mxu2 %v1423_v23  ;;  %837 = vmatpush.msra.mxu3 %v1425_v24 }
 0x250   :  { %744 = vmatpush.msra.mxu1 %v1481_v40 }
 0x251   :  { %818 = vmatpush.msra.mxu2 %v1433_v26  ;;  %838 = vmatpush.msra.mxu3 %v1435_v27 }
 0x252   :  { %745 = vmatpush.msra.mxu1 %v1494_v44 }
 0x253   :  { %819 = vmatpush.msra.mxu2 %v1443_v29  ;;  %839 = vmatpush.msra.mxu3 %v1445_v30 }
 0x254   :  { %746 = vmatpush.msra.mxu1 %v1501_v45 }
 0x255   :  { %820 = vmatpush.msra.mxu2 %v1453_v32  ;;  %840 = vmatpush.msra.mxu3 %v1455_v33 }
 0x256   :  { %747 = vmatpush.msra.mxu1 %v1505_v46 }
 0x257   :  { %821 = vmatpush.msra.mxu2 %v1938_v0  ;;  %841 = vmatpush.msra.mxu3 %v1939_v1  ;;  %v1171_v0 = vld [vmem:[#allocation8 + $0x108] sm:$0xff]  ;;  %v1172_v1 = vld [vmem:[#allocation8 + $0x110] sm:$0xff] }
 0x258   :  { %748 = vmatpush.msra.mxu1 %v1940_v2  ;;  %v1824_v2 = vld [vmem:[#allocation8 + $0x100] sm:$0xff] }
 0x259   :  { %822 = vmatpush.msra.mxu2 %v1941_v3  ;;  %842 = vmatpush.msra.mxu3 %v1942_v4  ;;  %v1174_v3 = vld [vmem:[#allocation8 + $0xf0] sm:$0xff]  ;;  %v1175_v4 = vld [vmem:[#allocation8 + $0xf8] sm:$0xff] }
 0x25a   :  { %749 = vmatpush.msra.mxu1 %v1943_v5  ;;  %v1827_v5 = vld [vmem:[#allocation8 + $0xe8] sm:$0xff] }
 0x25b   :  { %823 = vmatpush.msra.mxu2 %v1944_v6  ;;  %843 = vmatpush.msra.mxu3 %v1945_v7  ;;  %v1177_v6 = vld [vmem:[#allocation8 + $0xd8] sm:$0xff]  ;;  %v1178_v7 = vld [vmem:[#allocation8 + $0xe0] sm:$0xff] }
 0x2b8   :  { %v483_v9 = vpop.f32.mrf.mxu1 }
 0x2b9   :  { %v527_v10 = vadd.f32 %v483_v9, %v463_v8  ;;  %v1830_v8 = vld [vmem:[#allocation8 + $0xd0] sm:$0xff]  ;;  %v1180_v9 = vld [vmem:[#allocation8 + $0xc0] sm:$0xff] }
 0x2bb   :  { %v1059_v11 = vmul.f32 -1.442695, %v527_v10  ;;  %v1181_v10 = vld [vmem:[#allocation8 + $0xc8] sm:$0xff] }
 0x2bd   :  { %1108 = vpow2.f32 %v1059_v11  ;;  %v1833_v11 = vld [vmem:[#allocation8 + $0xb8] sm:$0xff] }
 0x2be   :  { %v503_v13 = vpop.f32.mrf.mxu2 }
 0x2bf   :  { %v547_v14 = vadd.f32 %v503_v13, %v464_v12  ;;  %v523_v27 = vpop.f32.mrf.mxu3  ;;  %v1183_v12 = vld [vmem:[#allocation8 + $0xa8] sm:$0xff]  ;;  %v1184_v13 = vld [vmem:[#allocation8 + $0xb0] sm:$0xff] }
 0x2c0   :  { %v526_v32 = vadd.f32 %v1631_v41, %v523_v27  ;;  %v1198_v27 = vld [vmem:[#allocation8 + $0x30] sm:$0xff] }
 0x2c1   :  { %v1060_v15 = vmul.f32 -1.442695, %v547_v14  ;;  %v1836_v14 = vld [vmem:[#allocation8 + $0xa0] sm:$0xff] }
 0x2c3   :  { %v1109_v16 = vpop.eup %1108  ;;  %1110 = vpow2.f32 %v1060_v15  ;;  %v1186_v15 = vld [vmem:[#allocation8 + $0x90] sm:$0xff] }
 0x2c4   :  { %v531_v17 = vadd.f32 1.0, %v1109_v16  ;;  %v1187_v16 = vld [vmem:[#allocation8 + $0x98] sm:$0xff] }
 0x2c6   :  { %1112 = vrcp.f32 %v531_v17  ;;  %v543_v23 = vand.u32 2147483648, %v531_v17  ;;  %v541_v25 = vand.u32 2147483647, %v531_v17  ;;  %vm537_vm9 = vweird.f32 %v531_v17 }
 0x2c8   :  { %v544_v30 = vor.u32 1.1754944e-38, %v543_v23  ;;  %vm542_vm11 = vcmp.eq.f32.partialorder %v541_v25, 8.507059e+37  ;;  %v1845_v23 = vld [vmem:[#allocation8 + $0x58] sm:$0xff]  ;;  %v1196_v25 = vld [vmem:[#allocation8 + $0x50] sm:$0xff] }
 0x2c9   :  { %v1111_v18 = vpop.eup %1110 }
 0x2ca   :  { %v551_v19 = vadd.f32 1.0, %v1111_v18  ;;  %v1189_v18 = vld [vmem:[#allocation8 + $0x78] sm:$0xff] }
 0x2cc   :  { %v1113_v20 = vpop.eup %1112  ;;  %1114 = vrcp.f32 %v551_v19  ;;  %v563_v44 = vand.u32 2147483648, %v551_v19  ;;  %v561_v46 = vand.u32 2147483647, %v551_v19  ;;  %vm557_vm13 = vweird.f32 %v551_v19 }
 0x2cd   :  { %v533_v21 = vmul.f32 %v1113_v20, %v531_v17  ;;  %vm538_vm8 = vweird.f32 %v1113_v20  ;;  %v1839_v17 = vld [vmem:[#allocation8 + $0x88] sm:$0xff] }
 0x2ce   :  { %vm539_vm10 = vmor %vm537_vm9, %vm538_vm8  ;;  %v564_v35 = vor.u32 1.1754944e-38, %v563_v44  ;;  %vm562_vm15 = vcmp.eq.f32.partialorder %v561_v46, 8.507059e+37 }
 0x2cf   :  { %v534_v22 = vsub.f32 1.0, %v533_v21  ;;  %v1192_v21 = vld [vmem:[#allocation8 + $0x60] sm:$0xff] }
 0x2d1   :  { %v535_v24 = vmul.f32 %v1113_v20, %v534_v22  ;;  %v1193_v22 = vld [vmem:[#allocation8 + $0x68] sm:$0xff] }
 0x2d2   :  { %v1115_v26 = vpop.eup %1114 }
 0x2d3   :  { %v553_v28 = vmul.f32 %v1115_v26, %v551_v19  ;;  %v536_v29 = vadd.f32 %v1113_v20, %v535_v24  ;;  %vm558_vm12 = vweird.f32 %v1115_v26  ;;  %v1190_v19 = vld [vmem:[#allocation8 + $0x80] sm:$0xff]  ;;  %v1195_v24 = vld [vmem:[#allocation8 + $0x48] sm:$0xff] }
 0x2d4   :  { %vm559_vm14 = vmor %vm557_vm13, %vm558_vm12 }
 0x2d5   :  { %v554_v31 = vsub.f32 1.0, %v553_v28  ;;  %v540_v33 = vsel %vm539_vm10, %v1113_v20, %v536_v29  ;;  %v1842_v20 = vld [vmem:[#allocation8 + $0x70] sm:$0xff]  ;;  %v1199_v28 = vld [vmem:[#allocation8 + $0x38] sm:$0xff]  ;;  %v1851_v29 = vld [vmem:[#allocation8 + $0x28] sm:$0xff] }
 0x2d6   :  { %v545_v37 = vsel %vm542_vm11, %v544_v30, %v540_v33  ;;  %v1201_v30 = vld [vmem:[#allocation8 + $0x18] sm:$0xff]  ;;  %v1204_v33 = vld [vmem:[#allocation8] sm:$0xff] }
 0x2d7   :  { %v555_v40 = vmul.f32 %v1115_v26, %v554_v31  ;;  %v567_v45 = vmul.f32 %v545_v37, %v526_v32  ;;  %v1202_v31 = vld [vmem:[#allocation8 + $0x20] sm:$0xff]  ;;  %v1854_v32 = vld [vmem:[#allocation8 + $0x10] sm:$0xff]  ;;  %v577_v37 = vld [vmem:[#allocation3 + $0x60] sm:$0xff] }
 0x2d9   :  { %v556_v56 = vadd.f32 %v1115_v26, %v555_v40  ;;  %v568_v54 = vadd.f32 %v567_v45, %v465_v34  ;;  %v1205_v34 = vld [vmem:[#allocation8 + $0x8] sm:$0xff]  ;;  %v578_v40 = vld [vmem:[#allocation3 + $0x68] sm:$0xff] }
 0x2db   :  { %v560_v55 = vsel %vm559_vm14, %v1115_v26, %v556_v56  ;;  %1116 = vtanh.f32 %v568_v54  ;;  %v1848_v26 = vld [vmem:[#allocation8 + $0x40] sm:$0xff] }
 0x2dc   :  { %v565_v48 = vsel %vm562_vm15, %v564_v35, %v560_v55 }
 0x2dd   :  { %v570_v49 = vsub.f32 1.0, %v565_v48  ;;  %v572_v61 = vmul.f32 %v565_v48, %v1747_v63  ;;  %v1821_v63 = vld [vmem:[#allocation8 + $0x118] sm:$0xff] }
 0x2e1   :  { %v1117_v50 = vpop.eup %1116 }
 0x2e2   :  { %v571_v59 = vmul.f32 %v1117_v50, %v570_v49 }
 0x2e4   :  { %v1803_v60 = vadd.f32 %v572_v61, %v571_v59 }
 0x2e6   :  { %575 = vst [vmem:[#allocation9 + $0x18] sm:$0xff] %v1803_v60  ;;  %596 = vmatmul.f32.vlgmr.msrb.gmra.mxu0 %v1803_v60  ;;  %616 = vmatmul.f32.vlgmr.msrb.gmra.mxu1 %v1803_v60 }
 0x2e7   :  { %636 = vmatmul.f32.vlgmr.msrb.gmra.mxu2 %v1803_v60  ;;  %848 = vmatpush.msrb.mxu0 %v1809_v43 }
 0x2e8   :  { %922 = vmatpush.msrb.mxu1 %v1159_v47  ;;  %942 = vmatpush.msrb.mxu2 %v1160_v53 }
 0x2e9   :  { %849 = vmatpush.msrb.mxu0 %v1812_v52 }
 0x2ea   :  { %923 = vmatpush.msrb.mxu1 %v1162_v51  ;;  %943 = vmatpush.msrb.mxu2 %v1163_v57 }
 0x2eb   :  { %850 = vmatpush.msrb.mxu0 %v1815_v38 }
 0x2ec   :  { %924 = vmatpush.msrb.mxu1 %v1165_v36  ;;  %944 = vmatpush.msrb.mxu2 %v1166_v39 }
 0x2ed   :  { %851 = vmatpush.msrb.mxu0 %v1818_v62 }
 0x2ee   :  { %925 = vmatpush.msrb.mxu1 %v1168_v42  ;;  %945 = vmatpush.msrb.mxu2 %v1169_v58 }
 0x2ef   :  { %852 = vmatpush.msrb.mxu0 %v1821_v63 }
 0x2f0   :  { %926 = vmatpush.msrb.mxu1 %v1171_v0  ;;  %946 = vmatpush.msrb.mxu2 %v1172_v1 }
 0x2f1   :  { %853 = vmatpush.msrb.mxu0 %v1824_v2 }
 0x2f2   :  { %927 = vmatpush.msrb.mxu1 %v1174_v3  ;;  %947 = vmatpush.msrb.mxu2 %v1175_v4 }
 0x2f3   :  { %854 = vmatpush.msrb.mxu0 %v1827_v5 }
 0x2f4   :  { %928 = vmatpush.msrb.mxu1 %v1177_v6  ;;  %948 = vmatpush.msrb.mxu2 %v1178_v7 }
 0x2f5   :  { %855 = vmatpush.msrb.mxu0 %v1830_v8 }
 0x2f6   :  { %929 = vmatpush.msrb.mxu1 %v1180_v9  ;;  %949 = vmatpush.msrb.mxu2 %v1181_v10  ;;  %v579_v9 = vld [vmem:[#allocation3 + $0x70] sm:$0xff] }
 0x2f7   :  { %856 = vmatpush.msrb.mxu0 %v1833_v11 }
 0x2f8   :  { %930 = vmatpush.msrb.mxu1 %v1183_v12  ;;  %950 = vmatpush.msrb.mxu2 %v1184_v13 }
 0x2f9   :  { %857 = vmatpush.msrb.mxu0 %v1836_v14 }
 0x2fa   :  { %931 = vmatpush.msrb.mxu1 %v1186_v15  ;;  %951 = vmatpush.msrb.mxu2 %v1187_v16 }
 0x2fb   :  { %858 = vmatpush.msrb.mxu0 %v1839_v17 }
 0x2fc   :  { %932 = vmatpush.msrb.mxu1 %v1189_v18  ;;  %952 = vmatpush.msrb.mxu2 %v1190_v19 }
 0x2fd   :  { %859 = vmatpush.msrb.mxu0 %v1842_v20 }
 0x2fe   :  { %933 = vmatpush.msrb.mxu1 %v1192_v21  ;;  %953 = vmatpush.msrb.mxu2 %v1193_v22 }
 0x2ff   :  { %860 = vmatpush.msrb.mxu0 %v1845_v23 }
 0x300   :  { %934 = vmatpush.msrb.mxu1 %v1195_v24  ;;  %954 = vmatpush.msrb.mxu2 %v1196_v25 }
 0x301   :  { %861 = vmatpush.msrb.mxu0 %v1848_v26 }
 0x302   :  { %935 = vmatpush.msrb.mxu1 %v1198_v27  ;;  %955 = vmatpush.msrb.mxu2 %v1199_v28 }
 0x303   :  { %862 = vmatpush.msrb.mxu0 %v1851_v29 }
 0x304   :  { %936 = vmatpush.msrb.mxu1 %v1201_v30  ;;  %956 = vmatpush.msrb.mxu2 %v1202_v31 }
 0x305   :  { %863 = vmatpush.msrb.mxu0 %v1854_v32 }
 0x306   :  { %937 = vmatpush.msrb.mxu1 %v1204_v33  ;;  %957 = vmatpush.msrb.mxu2 %v1205_v34 }
 0x363   :  { %v597_v44 = vpop.f32.mrf.mxu0  ;;  %v617_v45 = vpop.f32.mrf.mxu1 }
 0x364   :  { %v641_v46 = vadd.f32 %v597_v44, %v577_v37  ;;  %v661_v56 = vadd.f32 %v617_v45, %v578_v40  ;;  %v1884_v45 = vld [vmem:[%s1896_s3] ss:$0 sm:$0xff]  ;;  %s1314_s3 = smov [#allocation9]  }
 0x365   :  { %s1037_s7 = sshll.u32 %s1314_s3, 4  ;;  %s1038_s7 = int_to_ptr.vmem [resolvable:$true] %s1037_s7 }
 0x366   :  { %v1061_v54 = vmul.f32 -1.442695, %v641_v46  ;;  %v1062_v35 = vmul.f32 -1.442695, %v661_v56 }
 0x368   :  { %1118 = vpow2.f32 %v1061_v54 }
 0x369   :  { %1120 = vpow2.f32 %v1062_v35 }
 0x36a   :  { %v637_v0 = vpop.f32.mrf.mxu2 }
 0x36b   :  { %v640_v4 = vadd.f32 %v1631_v41, %v637_v0  ;;  %v806_v0 = vld [vmem:[#allocation3 + $0x98] sm:$0xff] }
 0x36e   :  { %v1119_v55 = vpop.eup %1118 }
 0x36f   :  { %v1121_v48 = vpop.eup %1120  ;;  %v645_v49 = vadd.f32 1.0, %v1119_v55  ;;  %v693_v55 = vld [vmem:[#allocation3 + $0x88] sm:$0xff] }
 0x370   :  { %v665_v50 = vadd.f32 1.0, %v1121_v48 }
 0x371   :  { %1122 = vrcp.f32 %v645_v49  ;;  %v657_v36 = vand.u32 2147483648, %v645_v49  ;;  %v655_v42 = vand.u32 2147483647, %v645_v49  ;;  %vm651_vm1 = vweird.f32 %v645_v49 }
 0x372   :  { %1124 = vrcp.f32 %v665_v50  ;;  %v677_v12 = vand.u32 2147483648, %v665_v50  ;;  %vm671_vm5 = vweird.f32 %v665_v50  ;;  %v675_v15 = vand.u32 2147483647, %v665_v50 }
 0x373   :  { %v658_v3 = vor.u32 1.1754944e-38, %v657_v36  ;;  %vm656_vm3 = vcmp.eq.f32.partialorder %v655_v42, 8.507059e+37 }
 0x374   :  { %v678_v19 = vor.u32 1.1754944e-38, %v677_v12  ;;  %vm676_vm7 = vcmp.eq.f32.partialorder %v675_v15, 8.507059e+37 }
 0x377   :  { %v1123_v59 = vpop.eup %1122 }
 0x378   :  { %v1125_v61 = vpop.eup %1124  ;;  %v647_v47 = vmul.f32 %v1123_v59, %v645_v49  ;;  %vm652_vm0 = vweird.f32 %v1123_v59 }
 0x379   :  { %v667_v53 = vmul.f32 %v1125_v61, %v665_v50  ;;  %vm653_vm2 = vmor %vm651_vm1, %vm652_vm0  ;;  %vm672_vm4 = vweird.f32 %v1125_v61 }
 0x37a   :  { %v648_v51 = vsub.f32 1.0, %v647_v47  ;;  %vm673_vm6 = vmor %vm671_vm5, %vm672_vm4 }
 0x37b   :  { %v668_v57 = vsub.f32 1.0, %v667_v53 }
 0x37c   :  { %v649_v39 = vmul.f32 %v1123_v59, %v648_v51 }
 0x37d   :  { %v669_v58 = vmul.f32 %v1125_v61, %v668_v57 }
 0x37e   :  { %v650_v1 = vadd.f32 %v1123_v59, %v649_v39 }
 0x37f   :  { %v670_v7 = vadd.f32 %v1125_v61, %v669_v58  ;;  %v805_v58 = vld [vmem:[#allocation3 + $0x90] sm:$0xff] }
 0x380   :  { %v654_v6 = vsel %vm653_vm2, %v1123_v59, %v650_v1 }
 0x381   :  { %v659_v10 = vsel %vm656_vm3, %v658_v3, %v654_v6  ;;  %v674_v18 = vsel %vm673_vm6, %v1125_v61, %v670_v7 }
 0x382   :  { %v681_v13 = vmul.f32 %v659_v10, %v640_v4  ;;  %v679_v21 = vsel %vm676_vm7, %v678_v19, %v674_v18 }
 0x383   :  { %v684_v22 = vsub.f32 1.0, %v679_v21  ;;  %v686_v25 = vmul.f32 %v679_v21, %v1803_v60  ;;  %v692_v60 = vld [vmem:[#allocation3 + $0x80] sm:$0xff] }
 0x384   :  { %v682_v16 = vadd.f32 %v681_v13, %v579_v9 }
 0x386   :  { %1126 = vtanh.f32 %v682_v16 }
 0x38c   :  { %v1127_v24 = vpop.eup %1126 }
 0x38d   :  { %v685_v41 = vmul.f32 %v1127_v24, %v684_v22 }
 0x38f   :  { %v1859_v27 = vadd.f32 %v686_v25, %v685_v41 }
 0x391   :  { %689 = vst [vmem:[#allocation9 + $0x20] sm:$0xff] %v1859_v27  ;;  %710 = vmatmul.f32.vlgmr.msrb.gmra.mxu3 %v1859_v27  ;;  %730 = vmatmul.f32.vlgmr.msra.gmra.mxu0 %v1859_v27 }
 0x392   :  { %750 = vmatmul.f32.vlgmr.msra.gmra.mxu1 %v1859_v27  ;;  %962 = vmatpush.msrb.mxu3 %v1809_v43 }
 0x394   :  { %963 = vmatpush.msrb.mxu3 %v1812_v52 }
 0x396   :  { %964 = vmatpush.msrb.mxu3 %v1815_v38 }
 0x398   :  { %965 = vmatpush.msrb.mxu3 %v1818_v62  ;;  %v691_v62 = vld [vmem:[#allocation3 + $0x78] sm:$0xff] }
 0x39a   :  { %966 = vmatpush.msrb.mxu3 %v1821_v63 }
 0x39c   :  { %967 = vmatpush.msrb.mxu3 %v1824_v2 }
 0x39e   :  { %968 = vmatpush.msrb.mxu3 %v1827_v5 }
 0x3a0   :  { %969 = vmatpush.msrb.mxu3 %v1830_v8 }
 0x3a2   :  { %970 = vmatpush.msrb.mxu3 %v1833_v11 }
 0x3a4   :  { %971 = vmatpush.msrb.mxu3 %v1836_v14 }
 0x3a6   :  { %972 = vmatpush.msrb.mxu3 %v1839_v17 }
 0x3a8   :  { %973 = vmatpush.msrb.mxu3 %v1842_v20 }
 0x3aa   :  { %974 = vmatpush.msrb.mxu3 %v1845_v23 }
 0x3ac   :  { %975 = vmatpush.msrb.mxu3 %v1848_v26 }
 0x3ae   :  { %976 = vmatpush.msrb.mxu3 %v1851_v29 }
 0x3b0   :  { %977 = vmatpush.msrb.mxu3 %v1854_v32 }
 0x40e   :  { %v731_v43 = vpop.f32.mrf.mxu0 }
 0x40f   :  { %v775_v52 = vadd.f32 %v731_v43, %v692_v60  ;;  %v751_v37 = vpop.f32.mrf.mxu1 }
 0x410   :  { %v754_v46 = vadd.f32 %v1884_v45, %v751_v37 }
 0x411   :  { %v1064_v38 = vmul.f32 -1.442695, %v775_v52 }
 0x413   :  { %1128 = vpow2.f32 %v1064_v38 }
 0x414   :  { %v711_v63 = vpop.f32.mrf.mxu3 }
 0x415   :  { %v755_v2 = vadd.f32 %v711_v63, %v691_v62 }
 0x417   :  { %v1063_v5 = vmul.f32 -1.442695, %v755_v2 }
 0x419   :  { %v1129_v8 = vpop.eup %1128  ;;  %1130 = vpow2.f32 %v1063_v5 }
 0x41a   :  { %v779_v11 = vadd.f32 1.0, %v1129_v8  ;;  %v807_v8 = vld [vmem:[#allocation3 + $0xa0] sm:$0xff] }
 0x41c   :  { %1132 = vrcp.f32 %v779_v11  ;;  %v791_v48 = vand.u32 2147483648, %v779_v11  ;;  %vm785_vm13 = vweird.f32 %v779_v11  ;;  %v789_v50 = vand.u32 2147483647, %v779_v11 }
 0x41e   :  { %v792_v47 = vor.u32 1.1754944e-38, %v791_v48  ;;  %vm790_vm15 = vcmp.eq.f32.partialorder %v789_v50, 8.507059e+37 }
 0x41f   :  { %v1131_v14 = vpop.eup %1130 }
 0x420   :  { %v759_v17 = vadd.f32 1.0, %v1131_v14 }
 0x422   :  { %1134 = vrcp.f32 %v759_v17  ;;  %v1133_v20 = vpop.eup %1132  ;;  %v771_v31 = vand.u32 2147483648, %v759_v17  ;;  %v769_v33 = vand.u32 2147483647, %v759_v17  ;;  %vm765_vm9 = vweird.f32 %v759_v17 }
 0x423   :  { %v781_v23 = vmul.f32 %v1133_v20, %v779_v11  ;;  %vm786_vm12 = vweird.f32 %v1133_v20 }
 0x424   :  { %v772_v44 = vor.u32 1.1754944e-38, %v771_v31  ;;  %vm770_vm11 = vcmp.eq.f32.partialorder %v769_v33, 8.507059e+37  ;;  %vm787_vm14 = vmor %vm785_vm13, %vm786_vm12 }
 0x425   :  { %v782_v29 = vsub.f32 1.0, %v781_v23 }
 0x427   :  { %v783_v34 = vmul.f32 %v1133_v20, %v782_v29 }
 0x428   :  { %v1135_v26 = vpop.eup %1134 }
 0x429   :  { %v761_v28 = vmul.f32 %v1135_v26, %v759_v17  ;;  %vm766_vm8 = vweird.f32 %v1135_v26  ;;  %v784_v54 = vadd.f32 %v1133_v20, %v783_v34  ;;  %v919_v34 = vld [vmem:[#allocation3 + $0xa8] sm:$0xff] }
 0x42a   :  { %vm767_vm10 = vmor %vm765_vm9, %vm766_vm8 }
 0x42b   :  { %v762_v30 = vsub.f32 1.0, %v761_v28  ;;  %v788_v61 = vsel %vm787_vm14, %v1133_v20, %v784_v54 }
 0x42c   :  { %v793_v53 = vsel %vm790_vm15, %v792_v47, %v788_v61 }
 0x42d   :  { %v763_v32 = vmul.f32 %v1135_v26, %v762_v30  ;;  %v798_v51 = vsub.f32 1.0, %v793_v53  ;;  %v800_v39 = vmul.f32 %v793_v53, %v1859_v27 }
 0x42f   :  { %v764_v40 = vadd.f32 %v1135_v26, %v763_v32 }
 0x431   :  { %v768_v56 = vsel %vm767_vm10, %v1135_v26, %v764_v40 }
 0x432   :  { %v773_v35 = vsel %vm770_vm11, %v772_v44, %v768_v56 }
 0x433   :  { %v795_v49 = vmul.f32 %v773_v35, %v754_v46  ;;  %v920_v46 = vld [vmem:[#allocation3 + $0xb0] sm:$0xff] }
 0x435   :  { %v796_v59 = vadd.f32 %v795_v49, %v693_v55 }
 0x437   :  { %1136 = vtanh.f32 %v796_v59 }
 0x43d   :  { %v1137_v57 = vpop.eup %1136 }
 0x43e   :  { %v799_v36 = vmul.f32 %v1137_v57, %v798_v51 }
 0x440   :  { %v801_v42 = vadd.f32 %v800_v39, %v799_v36 }
 0x442   :  { %803 = vst [vmem:[#allocation9 + $0x28] sm:$0xff] %v801_v42  ;;  %824 = vmatmul.f32.vlgmr.msra.gmra.mxu2 %v801_v42  ;;  %844 = vmatmul.f32.vlgmr.msra.gmra.mxu3 %v801_v42 }
 0x443   :  { %864 = vmatmul.f32.vlgmr.msrb.gmra.mxu0 %v801_v42 }
 0x4c0   :  { %v865_v60 = vpop.f32.mrf.mxu0 }
 0x4c1   :  { %v868_v62 = vadd.f32 %v1884_v45, %v865_v60 }
 0x4c5   :  { %v825_v1 = vpop.f32.mrf.mxu2  ;;  %v845_v3 = vpop.f32.mrf.mxu3 }
 0x4c6   :  { %v869_v4 = vadd.f32 %v825_v1, %v805_v58  ;;  %v889_v6 = vadd.f32 %v845_v3, %v806_v0 }
 0x4c8   :  { %v1065_v7 = vmul.f32 -1.442695, %v869_v4  ;;  %v1066_v9 = vmul.f32 -1.442695, %v889_v6  ;;  %v921_v6 = vld [vmem:[#allocation3 + $0xb8] sm:$0xff] }
 0x4ca   :  { %1138 = vpow2.f32 %v1065_v7 }
 0x4cb   :  { %1140 = vpow2.f32 %v1066_v9 }
 0x4d0   :  { %v1139_v10 = vpop.eup %1138 }
 0x4d1   :  { %v1141_v12 = vpop.eup %1140  ;;  %v873_v13 = vadd.f32 1.0, %v1139_v10 }
 0x4d2   :  { %v893_v15 = vadd.f32 1.0, %v1141_v12 }
 0x4d3   :  { %1142 = vrcp.f32 %v873_v13  ;;  %v885_v24 = vand.u32 2147483648, %v873_v13  ;;  %v883_v27 = vand.u32 2147483647, %v873_v13  ;;  %vm879_vm1 = vweird.f32 %v873_v13 }
 0x4d4   :  { %1144 = vrcp.f32 %v893_v15  ;;  %v905_v14 = vand.u32 2147483648, %v893_v15  ;;  %vm899_vm5 = vweird.f32 %v893_v15  ;;  %v903_v17 = vand.u32 2147483647, %v893_v15 }
 0x4d5   :  { %v886_v38 = vor.u32 1.1754944e-38, %v885_v24  ;;  %vm884_vm3 = vcmp.eq.f32.partialorder %v883_v27, 8.507059e+37 }
 0x4d6   :  { %v906_v26 = vor.u32 1.1754944e-38, %v905_v14  ;;  %vm904_vm7 = vcmp.eq.f32.partialorder %v903_v17, 8.507059e+37 }
 0x4d9   :  { %v1143_v16 = vpop.eup %1142 }
 0x4da   :  { %v1145_v18 = vpop.eup %1144  ;;  %v875_v19 = vmul.f32 %v1143_v16, %v873_v13  ;;  %vm880_vm0 = vweird.f32 %v1143_v16 }
 0x4db   :  { %v895_v21 = vmul.f32 %v1145_v18, %v893_v15  ;;  %vm881_vm2 = vmor %vm879_vm1, %vm880_vm0  ;;  %vm900_vm4 = vweird.f32 %v1145_v18 }
 0x4dc   :  { %v876_v22 = vsub.f32 1.0, %v875_v19  ;;  %vm901_vm6 = vmor %vm899_vm5, %vm900_vm4 }
 0x4dd   :  { %v896_v41 = vsub.f32 1.0, %v895_v21 }
 0x4de   :  { %v877_v25 = vmul.f32 %v1143_v16, %v876_v22 }
 0x4df   :  { %v897_v43 = vmul.f32 %v1145_v18, %v896_v41 }
 0x4e0   :  { %v878_v52 = vadd.f32 %v1143_v16, %v877_v25 }
 0x4e1   :  { %v898_v5 = vadd.f32 %v1145_v18, %v897_v43 }
 0x4e2   :  { %v882_v63 = vsel %vm881_vm2, %v1143_v16, %v878_v52 }
 0x4e3   :  { %v887_v2 = vsel %vm884_vm3, %v886_v38, %v882_v63  ;;  %v902_v23 = vsel %vm901_vm6, %v1145_v18, %v898_v5 }
 0x4e4   :  { %v909_v11 = vmul.f32 %v887_v2, %v868_v62  ;;  %v907_v28 = vsel %vm904_vm7, %v906_v26, %v902_v23 }
 0x4e5   :  { %v912_v29 = vsub.f32 1.0, %v907_v28  ;;  %v914_v32 = vmul.f32 %v907_v28, %v801_v42 }
 0x4e6   :  { %v910_v20 = vadd.f32 %v909_v11, %v807_v8 }
 0x4e8   :  { %1146 = vtanh.f32 %v910_v20 }
 0x4ee   :  { %v1147_v30 = vpop.eup %1146 }
 0x4ef   :  { %v913_v31 = vmul.f32 %v1147_v30, %v912_v29 }
 0x4f1   :  { %v915_v33 = vadd.f32 %v914_v32, %v913_v31 }
 0x4f3   :  { %917 = vst [vmem:[#allocation9 + $0x30] sm:$0xff] %v915_v33  ;;  %938 = vmatmul.f32.vlgmr.msrb.gmra.mxu1 %v915_v33  ;;  %958 = vmatmul.f32.vlgmr.msrb.gmra.mxu2 %v915_v33 }
 0x4f4   :  { %978 = vmatmul.f32.vlgmr.msrb.gmra.mxu3 %v915_v33 }
 0x570   :  { %v939_v37 = vpop.f32.mrf.mxu1 }
 0x571   :  { %v983_v40 = vadd.f32 %v939_v37, %v919_v34 }
 0x573   :  { %v1067_v44 = vmul.f32 -1.442695, %v983_v40 }
 0x575   :  { %1148 = vpow2.f32 %v1067_v44 }
 0x576   :  { %v959_v56 = vpop.f32.mrf.mxu2 }
 0x577   :  { %v1003_v54 = vadd.f32 %v959_v56, %v920_v46  ;;  %v979_v39 = vpop.f32.mrf.mxu3 }
 0x578   :  { %v982_v3 = vadd.f32 %v1884_v45, %v979_v39 }
 0x579   :  { %v1068_v35 = vmul.f32 -1.442695, %v1003_v54 }
 0x57b   :  { %v1149_v55 = vpop.eup %1148  ;;  %1150 = vpow2.f32 %v1068_v35 }
 0x57c   :  { %v987_v48 = vadd.f32 1.0, %v1149_v55 }
 0x57e   :  { %1152 = vrcp.f32 %v987_v48  ;;  %v999_v53 = vand.u32 2147483648, %v987_v48  ;;  %v997_v57 = vand.u32 2147483647, %v987_v48  ;;  %vm993_vm9 = vweird.f32 %v987_v48 }
 0x580   :  { %v1000_v0 = vor.u32 1.1754944e-38, %v999_v53  ;;  %vm998_vm11 = vcmp.eq.f32.partialorder %v997_v57, 8.507059e+37 }
 0x581   :  { %v1151_v49 = vpop.eup %1150 }
 0x582   :  { %v1007_v50 = vadd.f32 1.0, %v1151_v49 }
 0x584   :  { %v1153_v59 = vpop.eup %1152  ;;  %1154 = vrcp.f32 %v1007_v50  ;;  %v1019_v10 = vand.u32 2147483648, %v1007_v50  ;;  %v1017_v13 = vand.u32 2147483647, %v1007_v50  ;;  %vm1013_vm13 = vweird.f32 %v1007_v50 }
 0x585   :  { %v989_v61 = vmul.f32 %v1153_v59, %v987_v48  ;;  %vm994_vm8 = vweird.f32 %v1153_v59 }
 0x586   :  { %vm995_vm10 = vmor %vm993_vm9, %vm994_vm8  ;;  %v1020_v18 = vor.u32 1.1754944e-38, %v1019_v10  ;;  %vm1018_vm15 = vcmp.eq.f32.partialorder %v1017_v13, 8.507059e+37 }
 0x587   :  { %v990_v47 = vsub.f32 1.0, %v989_v61 }
 0x589   :  { %v991_v51 = vmul.f32 %v1153_v59, %v990_v47 }
 0x58a   :  { %v1155_v36 = vpop.eup %1154 }
 0x58b   :  { %v1009_v42 = vmul.f32 %v1155_v36, %v1007_v50  ;;  %v992_v58 = vadd.f32 %v1153_v59, %v991_v51  ;;  %vm1014_vm12 = vweird.f32 %v1155_v36 }
 0x58c   :  { %vm1015_vm14 = vmor %vm1013_vm13, %vm1014_vm12 }
 0x58d   :  { %v1010_v1 = vsub.f32 1.0, %v1009_v42  ;;  %v996_v4 = vsel %vm995_vm10, %v1153_v59, %v992_v58 }
 0x58e   :  { %v1001_v7 = vsel %vm998_vm11, %v1000_v0, %v996_v4 }
 0x58f   :  { %v1011_v9 = vmul.f32 %v1155_v36, %v1010_v1  ;;  %v1023_v12 = vmul.f32 %v1001_v7, %v982_v3 }
 0x591   :  { %v1012_v15 = vadd.f32 %v1155_v36, %v1011_v9  ;;  %v1024_v16 = vadd.f32 %v1023_v12, %v921_v6 }
 0x593   :  { %v1016_v19 = vsel %vm1015_vm14, %v1155_v36, %v1012_v15  ;;  %1156 = vtanh.f32 %v1024_v16 }
 0x594   :  { %v1021_v21 = vsel %vm1018_vm15, %v1020_v18, %v1016_v19 }
 0x595   :  { %v1026_v22 = vsub.f32 1.0, %v1021_v21  ;;  %v1028_v41 = vmul.f32 %v1021_v21, %v915_v33 }
 0x599   :  { %v1157_v45 = vpop.eup %1156 }
 0x59a   :  { %v1027_v24 = vmul.f32 %v1157_v45, %v1026_v22 }
 0x59c   :  { %v1029_v25 = vadd.f32 %v1028_v41, %v1027_v24 }
 0x59e   :  { %1031 = vst [vmem:[#allocation9 + $0x38] sm:$0xff] %v1029_v25 }
 0x59f   :  { %1045 = dma.vmem_to_hbm [thread:$0]  %s1038_s7, 1024, %s1040_s10, [#allocation5], %s1315_s11, %s1315_s11, %s1316_s12  }
 0x5a0   :  { %1307 = dma.done.wait [#allocation5], 1024  }
 0x5a1   :  { %1308 = vsyncadd [#allocation5], 4294966272 }
 0x5a2   :  { %1050 = vsyncpa [#allocation4], 1 }
 0x5a3   :  { %1051 = vsyncpa [#allocation7], 1 }
 0x5a4   :  { %1052 = vsyncpa [#allocation5], 1 }

</bundles_post_ra>
